<compile_context>
chip_gen: v5e
topology: v5e:2x2
jax: 0.10.0
libtpu: 0.0.40
codegen_flags: <defaults>
</compile_context>

<pallas_src>
import jax
import jax.numpy as jnp
from jax.experimental import pallas as pl
from jax.experimental.pallas import tpu as pltpu


# ---------------------------------------------------------------------------
# Kernels
# ---------------------------------------------------------------------------
def linear_sparse_kernel(x_ref, w_ref, b_ref, o_ref):
    """x_ref: (TB, G) f32; w_ref: (L, G, G) bf16 (in, out); b_ref: (L, 1, G) f32."""
    x = x_ref[...]
    mask = x
    num_layers = w_ref.shape[0]
    # Static unroll is fine for tiny L (=2); for L >= 8 switch to lax.fori_loop
    # with dynamic w_ref[i] indexing to bound vreg live ranges.
    for i in range(num_layers):
        z = jnp.dot(
            mask.astype(jnp.bfloat16),            # activations -> bf16 for the MXU
            w_ref[i],                              # (G, G) bf16, already (in, out)
            preferred_element_type=jnp.float32,    # f32 accumulation
        )
        mask = jnp.maximum(z + b_ref[i], 0.0)      # f32 bias add + ReLU
    # torch: (sigmoid(mask) >= 0.5) * x  ==  (mask >= 0.0) * x  (sigmoid folded).
    o_ref[...] = jnp.where(mask >= 0.0, x, jnp.zeros_like(x)).astype(o_ref.dtype)


def _identity_kernel(x_ref, o_ref):
    # Gate is provably always true -> output == x.  Input HBM buffer is aliased
    # onto the output, so this is a cheap in-place pass-through.
    o_ref[...] = x_ref[...]


# ---------------------------------------------------------------------------
# Host-side helpers
# ---------------------------------------------------------------------------
def _round_up(n, m):
    return ((n + m - 1) // m) * m


def _vmem_capacity_bytes():
    try:
        return int(pltpu.get_tpu_info().vmem_capacity_bytes)
    except Exception:
        return 64 * 1024 * 1024  # conservative: v7x per-TensorCore VMEM


def _num_tensorcores():
    # v7x has 2 TensorCores per chip (sharded via the "parallel" grid axis);
    # v5e / v6e have a single TensorCore.
    try:
        kind = jax.devices()[0].device_kind.lower()
    except Exception:
        return 1
    return 2 if "7" in kind else 1


def _pick_batch_tile(batch, num_genes, num_layers, x_itemsize, w_itemsize,
                     vmem_cap, num_tc):
    """Largest sublane-aligned batch tile giving ~num_tc grid steps while keeping
    double-buffered x/out tiles + resident weights inside a VMEM budget."""
    sublane = 8 * max(1, 4 // x_itemsize)          # 8 rows for f32, 16 for bf16
    weights_bytes = num_layers * num_genes * num_genes * w_itemsize
    bias_bytes = num_layers * 8 * num_genes * 4    # (L,1,G) pads to 8 sublanes
    budget = int(0.6 * vmem_cap) - weights_bytes - bias_bytes
    bytes_per_row = 4 * num_genes * x_itemsize     # x + out tiles, double-buffered
    max_tb = max(sublane, (budget // bytes_per_row) // sublane * sublane)
    tb = _round_up(pl.cdiv(batch, num_tc), sublane)
    tb = min(tb, _round_up(batch, sublane), max_tb)
    return max(sublane, int(tb))


# ---------------------------------------------------------------------------
# Public wrapper
# ---------------------------------------------------------------------------
def linear_sparse(x, weights, biases, *, tb=None, fold_identity=False,
                  single_buffer_invariants=True):
    """Forward of Linear_sparse.

    x:       (B, G) float32 activations.
    weights: (L, G, G) bfloat16 stored (in, out) (torch weight.T per layer).
    biases:  (L, 1, G) float32.
    """
    B, G = x.shape
    L = weights.shape[0]

    if fold_identity:
        # Perf-review fast path: the gate is always true for finite activations,
        # so the module is the identity on x.  Alias the output onto the
        # (donated) input so no extra HBM buffer is created.  (The truly free
        # option is to elide the op in the caller entirely.)
        return pl.pallas_call(
            _identity_kernel,
            out_shape=jax.ShapeDtypeStruct(x.shape, x.dtype),
            input_output_aliases={0: 0},
        )(x)

    vmem_cap = _vmem_capacity_bytes()
    num_tc = _num_tensorcores()
    if tb is None:
        tb = _pick_batch_tile(B, G, L, x.dtype.itemsize, weights.dtype.itemsize,
                              vmem_cap, num_tc)
    grid = (pl.cdiv(B, tb),)

    cost = pl.CostEstimate(
        flops=2 * L * B * G * G,
        transcendentals=0,                 # sigmoid folded into a sign test
        bytes_accessed=(2 * x.size * x.dtype.itemsize
                        + weights.size * weights.dtype.itemsize
                        + biases.size * biases.dtype.itemsize),
    )

    def build(single_buffer):
        w_buffers = 1 if single_buffer else 2
        vmem_needed = (
            4 * tb * G * x.dtype.itemsize                      # x + out, double-buffered
            + w_buffers * L * G * G * weights.dtype.itemsize   # resident weights
            + w_buffers * L * 8 * G * biases.dtype.itemsize    # bias (8-sublane padded)
            + (4 << 20))                                       # compiler scratch headroom
        vmem_limit = int(min(max(vmem_needed, 16 << 20), 0.9 * vmem_cap))
        invariant_kw = {"pipeline_mode": pl.Buffered(1)} if single_buffer else {}
        return pl.pallas_call(
            linear_sparse_kernel,
            out_shape=jax.ShapeDtypeStruct((B, G), x.dtype),
            grid_spec=pltpu.PrefetchScalarGridSpec(
                num_scalar_prefetch=0,
                grid=grid,
                in_specs=[
                    pl.BlockSpec((tb, G), lambda i: (i, 0)),                   # x tile
                    pl.BlockSpec((L, G, G), lambda i: (0, 0, 0), **invariant_kw),  # weights
                    pl.BlockSpec((L, 1, G), lambda i: (0, 0, 0), **invariant_kw),  # biases
                ],
                out_specs=pl.BlockSpec((tb, G), lambda i: (i, 0)),
            ),
            compiler_params=pltpu.CompilerParams(
                dimension_semantics=("parallel",),     # batch axis -> TC sharding
                vmem_limit_bytes=vmem_limit,
            ),
            cost_estimate=cost,
        )

    if single_buffer_invariants:
        try:
            return build(True)(x, weights, biases)
        except Exception:
            # Fallback for jax versions without BlockSpec(pipeline_mode=...):
            # identical kernel with default (double-buffered) invariant blocks.
            pass
    return build(False)(x, weights, biases)


# ---------------------------------------------------------------------------
# Reference + self-test
# ---------------------------------------------------------------------------
def reference(x, weights, biases):
    """Pure-JAX reference mirroring the PyTorch forward exactly (incl. sigmoid)."""
    mask = x
    w = weights.astype(jnp.float32)
    for i in range(w.shape[0]):
        mask = jnp.maximum(mask @ w[i] + biases[i][0], 0.0)
    prob = jax.nn.sigmoid(mask)
    return (prob >= 0.5).astype(x.dtype) * x


if __name__ == "__main__":
    B = 512          # 1 grid step on v5e/v6e (1 TC), 2 steps on v7x (2 TCs)
    G = 128          # num_genes
    L = 2            # num_layers (module default)

    key = jax.random.PRNGKey(0)
    kx, kw, kb = jax.random.split(key, 3)

    x = jax.random.normal(kx, (B, G), dtype=jnp.float32)
    bound = 1.0 / jnp.sqrt(G)
    # PyTorch Linear weight is (out, in) applied as x @ W.T; store (in, out) bf16.
    w_torch = jax.random.uniform(kw, (L, G, G), jnp.float32, -bound, bound)
    weights = jnp.transpose(w_torch, (0, 2, 1)).astype(jnp.bfloat16)   # (L, in, out)
    biases = jax.random.uniform(kb, (L, 1, G), jnp.float32, -bound, bound)

    ref = reference(x, weights, biases)

    # Faithful path: full matmul chain + folded sigmoid gate.
    out = jax.block_until_ready(linear_sparse(x, weights, biases))
    assert out.shape == (B, G)
    assert jnp.allclose(out, ref, atol=1e-5, rtol=1e-5)

    # Perf-review fast path: gate provably always true -> identity on x
    # (called last: the aliased input buffer may be donated).
    out_fast = jax.block_until_ready(
        linear_sparse(x, weights, biases, fold_identity=True))
    assert jnp.allclose(out_fast, ref)

    print("KERNEL_OK")
</pallas_src>

<mosaic_0001>
module attributes {stable_mosaic.version = 11 : i64} {
  func.func @linear_sparse_kernel(%arg0: i32, %arg1: memref<512x128xf32, #tpu.memory_space<vmem>>, %arg2: memref<2x128x128xbf16, #tpu.memory_space<vmem>>, %arg3: memref<2x1x128xf32, #tpu.memory_space<vmem>>, %arg4: memref<512x128xf32, #tpu.memory_space<vmem>>) attributes {dimension_semantics = [#tpu.dimension_semantics<parallel>], iteration_bounds = array<i64: 1>, scalar_prefetch = 0 : i64, scratch_operands = 0 : i64, tpu.core_type = #tpu.core_type<tc>, window_params = [{transform_indices = @transform_0, window_bounds = array<i64: 512, 128>}, {pipeline_mode = #tpu.pipeline_mode<synchronous>, transform_indices = @transform_1, window_bounds = array<i64: 2, 128, 128>}, {pipeline_mode = #tpu.pipeline_mode<synchronous>, transform_indices = @transform_2, window_bounds = array<i64: 2, 1, 128>}, {transform_indices = @transform_3, window_bounds = array<i64: 512, 128>}]} {
    %c0 = arith.constant 0 : index
    %c0_0 = arith.constant 0 : index
    %0 = vector.load %arg1[%c0, %c0_0] : memref<512x128xf32, #tpu.memory_space<vmem>>, vector<512x128xf32>
    %1 = arith.truncf %0 : vector<512x128xf32> to vector<512x128xbf16>
    %c0_1 = arith.constant 0 : index
    %c0_2 = arith.constant 0 : index
    %c0_3 = arith.constant 0 : index
    %2 = vector.load %arg2[%c0_1, %c0_2, %c0_3] : memref<2x128x128xbf16, #tpu.memory_space<vmem>>, vector<1x128x128xbf16>
    %3 = vector.shape_cast %2 : vector<1x128x128xbf16> to vector<128x128xbf16>
    %cst = arith.constant dense<0.000000e+00> : vector<512x128xf32>
    %4 = tpu.matmul %1, %3, %cst {dimension_numbers = #tpu.dot_dimension_numbers<[1], [0], [0], [1], [0, 0, 1, 1], [], []>} : vector<512x128xbf16>, vector<128x128xbf16>, vector<512x128xf32> -> vector<512x128xf32>
    %c0_4 = arith.constant 0 : index
    %c0_5 = arith.constant 0 : index
    %c0_6 = arith.constant 0 : index
    %5 = vector.load %arg3[%c0_4, %c0_5, %c0_6] : memref<2x1x128xf32, #tpu.memory_space<vmem>>, vector<1x1x128xf32>
    %6 = vector.shape_cast %5 : vector<1x1x128xf32> to vector<1x128xf32>
    %7 = vector.broadcast %6 : vector<1x128xf32> to vector<512x128xf32>
    %8 = arith.addf %4, %7 : vector<512x128xf32>
    %cst_7 = arith.constant 0.000000e+00 : f32
    %9 = vector.broadcast %cst_7 : f32 to vector<512x128xf32>
    %10 = arith.maximumf %8, %9 : vector<512x128xf32>
    %11 = arith.truncf %10 : vector<512x128xf32> to vector<512x128xbf16>
    %c1 = arith.constant 1 : index
    %c0_8 = arith.constant 0 : index
    %c0_9 = arith.constant 0 : index
    %12 = vector.load %arg2[%c1, %c0_8, %c0_9] : memref<2x128x128xbf16, #tpu.memory_space<vmem>>, vector<1x128x128xbf16>
    %13 = vector.shape_cast %12 : vector<1x128x128xbf16> to vector<128x128xbf16>
    %cst_10 = arith.constant dense<0.000000e+00> : vector<512x128xf32>
    %14 = tpu.matmul %11, %13, %cst_10 {dimension_numbers = #tpu.dot_dimension_numbers<[1], [0], [0], [1], [0, 0, 1, 1], [], []>} : vector<512x128xbf16>, vector<128x128xbf16>, vector<512x128xf32> -> vector<512x128xf32>
    %c1_11 = arith.constant 1 : index
    %c0_12 = arith.constant 0 : index
    %c0_13 = arith.constant 0 : index
    %15 = vector.load %arg3[%c1_11, %c0_12, %c0_13] : memref<2x1x128xf32, #tpu.memory_space<vmem>>, vector<1x1x128xf32>
    %16 = vector.shape_cast %15 : vector<1x1x128xf32> to vector<1x128xf32>
    %17 = vector.broadcast %16 : vector<1x128xf32> to vector<512x128xf32>
    %18 = arith.addf %14, %17 : vector<512x128xf32>
    %cst_14 = arith.constant 0.000000e+00 : f32
    %19 = vector.broadcast %cst_14 : f32 to vector<512x128xf32>
    %20 = arith.maximumf %18, %19 : vector<512x128xf32>
    %cst_15 = arith.constant 0.000000e+00 : f32
    %21 = vector.broadcast %cst_15 : f32 to vector<512x128xf32>
    %22 = arith.cmpf oge, %20, %21 : vector<512x128xf32>
    %cst_16 = arith.constant 0.000000e+00 : f32
    %23 = vector.broadcast %cst_16 : f32 to vector<512x128xf32>
    %24 = arith.select %22, %0, %23 : vector<512x128xi1>, vector<512x128xf32>
    %c0_17 = arith.constant 0 : index
    %c0_18 = arith.constant 0 : index
    %25 = vector.load %arg4[%c0_17, %c0_18] : memref<512x128xf32, #tpu.memory_space<vmem>>, vector<512x128xf32>
    tpu.vector_store %arg4[%c0_17, %c0_18], %24 {strides = array<i32>} : memref<512x128xf32, #tpu.memory_space<vmem>>, vector<512x128xf32>,
    return
  }
  func.func @transform_0(%arg0: i32) -> (i32, i32) {
    %c0_i32 = arith.constant 0 : i32
    %c0_i32_0 = arith.constant 0 : i32
    return %arg0, %c0_i32 : i32, i32
  }
  func.func @transform_1(%arg0: i32) -> (i32, i32, i32) {
    %c0_i32 = arith.constant 0 : i32
    %c0_i32_0 = arith.constant 0 : i32
    %c0_i32_1 = arith.constant 0 : i32
    %c0_i32_2 = arith.constant 0 : i32
    return %c0_i32, %c0_i32_0, %c0_i32_1 : i32, i32, i32
  }
  func.func @transform_2(%arg0: i32) -> (i32, i32, i32) {
    %c0_i32 = arith.constant 0 : i32
    %c0_i32_0 = arith.constant 0 : i32
    %c0_i32_1 = arith.constant 0 : i32
    %c0_i32_2 = arith.constant 0 : i32
    return %c0_i32, %c0_i32_0, %c0_i32_1 : i32, i32, i32
  }
  func.func @transform_3(%arg0: i32) -> (i32, i32) {
    %c0_i32 = arith.constant 0 : i32
    %c0_i32_0 = arith.constant 0 : i32
    return %arg0, %c0_i32 : i32, i32
  }
}

module attributes {stable_mosaic.version = 11 : i64} {
  func.func @linear_sparse_kernel(%arg0: i32, %arg1: memref<512x128xf32, #tpu.memory_space<vmem>>, %arg2: memref<2x128x128xbf16, #tpu.memory_space<vmem>>, %arg3: memref<2x1x128xf32, #tpu.memory_space<vmem>>, %arg4: memref<512x128xf32, #tpu.memory_space<vmem>>) attributes {dimension_semantics = [#tpu.dimension_semantics<parallel>], iteration_bounds = array<i64: 1>, scalar_prefetch = 0 : i64, scratch_operands = 0 : i64, tpu.core_type = #tpu.core_type<tc>, window_params = [{transform_indices = @transform_0, window_bounds = array<i64: 512, 128>}, {pipeline_mode = #tpu.pipeline_mode<synchronous>, transform_indices = @transform_1, window_bounds = array<i64: 2, 128, 128>}, {pipeline_mode = #tpu.pipeline_mode<synchronous>, transform_indices = @transform_2, window_bounds = array<i64: 2, 1, 128>}, {transform_indices = @transform_3, window_bounds = array<i64: 512, 128>}]} {
    %c0 = arith.constant 0 : index
    %c0_0 = arith.constant 0 : index
    %0 = vector.load %arg1[%c0, %c0_0] : memref<512x128xf32, #tpu.memory_space<vmem>>, vector<512x128xf32>
    %1 = arith.truncf %0 : vector<512x128xf32> to vector<512x128xbf16>
    %c0_1 = arith.constant 0 : index
    %c0_2 = arith.constant 0 : index
    %c0_3 = arith.constant 0 : index
    %2 = vector.load %arg2[%c0_1, %c0_2, %c0_3] : memref<2x128x128xbf16, #tpu.memory_space<vmem>>, vector<1x128x128xbf16>
    %3 = vector.shape_cast %2 : vector<1x128x128xbf16> to vector<128x128xbf16>
    %cst = arith.constant dense<0.000000e+00> : vector<512x128xf32>
    %4 = tpu.matmul %1, %3, %cst {dimension_numbers = #tpu.dot_dimension_numbers<[1], [0], [0], [1], [0, 0, 1, 1], [], []>} : vector<512x128xbf16>, vector<128x128xbf16>, vector<512x128xf32> -> vector<512x128xf32>
    %c0_4 = arith.constant 0 : index
    %c0_5 = arith.constant 0 : index
    %c0_6 = arith.constant 0 : index
    %5 = vector.load %arg3[%c0_4, %c0_5, %c0_6] : memref<2x1x128xf32, #tpu.memory_space<vmem>>, vector<1x1x128xf32>
    %6 = vector.shape_cast %5 : vector<1x1x128xf32> to vector<1x128xf32>
    %7 = vector.broadcast %6 : vector<1x128xf32> to vector<512x128xf32>
    %8 = arith.addf %4, %7 : vector<512x128xf32>
    %cst_7 = arith.constant 0.000000e+00 : f32
    %9 = vector.broadcast %cst_7 : f32 to vector<512x128xf32>
    %10 = arith.maximumf %8, %9 : vector<512x128xf32>
    %11 = arith.truncf %10 : vector<512x128xf32> to vector<512x128xbf16>
    %c1 = arith.constant 1 : index
    %c0_8 = arith.constant 0 : index
    %c0_9 = arith.constant 0 : index
    %12 = vector.load %arg2[%c1, %c0_8, %c0_9] : memref<2x128x128xbf16, #tpu.memory_space<vmem>>, vector<1x128x128xbf16>
    %13 = vector.shape_cast %12 : vector<1x128x128xbf16> to vector<128x128xbf16>
    %cst_10 = arith.constant dense<0.000000e+00> : vector<512x128xf32>
    %14 = tpu.matmul %11, %13, %cst_10 {dimension_numbers = #tpu.dot_dimension_numbers<[1], [0], [0], [1], [0, 0, 1, 1], [], []>} : vector<512x128xbf16>, vector<128x128xbf16>, vector<512x128xf32> -> vector<512x128xf32>
    %c1_11 = arith.constant 1 : index
    %c0_12 = arith.constant 0 : index
    %c0_13 = arith.constant 0 : index
    %15 = vector.load %arg3[%c1_11, %c0_12, %c0_13] : memref<2x1x128xf32, #tpu.memory_space<vmem>>, vector<1x1x128xf32>
    %16 = vector.shape_cast %15 : vector<1x1x128xf32> to vector<1x128xf32>
    %17 = vector.broadcast %16 : vector<1x128xf32> to vector<512x128xf32>
    %18 = arith.addf %14, %17 : vector<512x128xf32>
    %cst_14 = arith.constant 0.000000e+00 : f32
    %19 = vector.broadcast %cst_14 : f32 to vector<512x128xf32>
    %20 = arith.maximumf %18, %19 : vector<512x128xf32>
    %cst_15 = arith.constant 0.000000e+00 : f32
    %21 = vector.broadcast %cst_15 : f32 to vector<512x128xf32>
    %22 = arith.cmpf oge, %20, %21 : vector<512x128xf32>
    %cst_16 = arith.constant 0.000000e+00 : f32
    %23 = vector.broadcast %cst_16 : f32 to vector<512x128xf32>
    %24 = arith.select %22, %0, %23 : vector<512x128xi1>, vector<512x128xf32>
    %c0_17 = arith.constant 0 : index
    %c0_18 = arith.constant 0 : index
    %25 = vector.load %arg4[%c0_17, %c0_18] : memref<512x128xf32, #tpu.memory_space<vmem>>, vector<512x128xf32>
    tpu.vector_store %arg4[%c0_17, %c0_18], %24 {strides = array<i32>} : memref<512x128xf32, #tpu.memory_space<vmem>>, vector<512x128xf32>,
    return
  }
  func.func @transform_0(%arg0: i32) -> (i32, i32) {
    %c0_i32 = arith.constant 0 : i32
    %c0_i32_0 = arith.constant 0 : i32
    return %arg0, %c0_i32 : i32, i32
  }
  func.func @transform_1(%arg0: i32) -> (i32, i32, i32) {
    %c0_i32 = arith.constant 0 : i32
    %c0_i32_0 = arith.constant 0 : i32
    %c0_i32_1 = arith.constant 0 : i32
    %c0_i32_2 = arith.constant 0 : i32
    return %c0_i32, %c0_i32_0, %c0_i32_1 : i32, i32, i32
  }
  func.func @transform_2(%arg0: i32) -> (i32, i32, i32) {
    %c0_i32 = arith.constant 0 : i32
    %c0_i32_0 = arith.constant 0 : i32
    %c0_i32_1 = arith.constant 0 : i32
    %c0_i32_2 = arith.constant 0 : i32
    return %c0_i32, %c0_i32_0, %c0_i32_1 : i32, i32, i32
  }
  func.func @transform_3(%arg0: i32) -> (i32, i32) {
    %c0_i32 = arith.constant 0 : i32
    %c0_i32_0 = arith.constant 0 : i32
    return %arg0, %c0_i32 : i32, i32
  }
}

</mosaic_0001>

<bundles_post_ra>
// kernel: tpu_custom_call.1
= control target key start
LH: loop header
LB: loop body
LE: loop exit
PB: predicated region body
PF: predicated region fallthrough
CT: control target
= control target key end

     0   :  { %8 = vsyncpa [#allocation3], 0  ;;  %s1547_s0 = inlined_call_operand.hbm [shape: f32[512,128], index: 0, kind: input, shape index: {}]   ;;  %s1548_s1 = inlined_call_operand.hbm [shape: bf16[2,128,128], index: 1, kind: input, shape index: {}]   ;;  %s1549_s2 = inlined_call_operand.hbm [shape: f32[2,1,128], index: 2, kind: input, shape index: {}]   ;;  %s1550_s3 = inlined_call_operand.hbm [shape: f32[512,128], index: 3, kind: output, shape index: {}]  }
   0x1   :  { %9 = vsyncpa [#allocation6], 0  ;;  %s28_s14 = sshll.u32 %s1548_s1, 4  ;;  %s29_s14 = int_to_ptr.hbm [resolvable:$true] %s28_s14 }
   0x2   :  { %10 = vsyncpa [#allocation4], 0  ;;  %s1251_s15 = smov [#allocation5]   ;;  %s15_s19 = sshll.u32 %s1547_s0, 4  ;;  %s16_s19 = int_to_ptr.hbm [resolvable:$true] %s15_s19 }
   0x3   :  { %s30_s16 = sshll.u32 %s1251_s15, 4  ;;  %s1252_s20 = smov 64   ;;  %s31_s16 = int_to_ptr.vmem [resolvable:$true] %s30_s16 }
   0x4   :  { %s1253_s21 = smov 4   ;;  %s1254_s22 = smov [#allocation2]  }
   0x5   :  { %36 = dma.hbm_to_vmem [thread:$0]  %s29_s14, 2048, %s31_s16, [#allocation6], %s1252_s20, %s1252_s20, %s1253_s21  }
   0x6   :  { %s17_s23 = sshll.u32 %s1254_s22, 4  ;;  %s1255_s24 = smov 128   ;;  %s18_s23 = int_to_ptr.vmem [resolvable:$true] %s17_s23 }
   0x7   :  { %s1256_s25 = smov 8   ;;  %s41_s27 = sshll.u32 %s1549_s2, 4  ;;  %s42_s27 = int_to_ptr.hbm [resolvable:$true] %s41_s27 }
   0x8   :  { %23 = dma.hbm_to_vmem [thread:$0]  %s16_s19, 8192, %s18_s23, [#allocation3], %s1255_s24, %s1255_s24, %s1256_s25  }
   0x9   :  { %s1257_s28 = smov [#allocation7]   ;;  %s1258_s29 = smov 16  }
   0xa   :  { %s43_s0 = sshll.u32 %s1257_s28, 4  ;;  %s1259_s30 = smov 1   ;;  %s44_s0 = int_to_ptr.vmem [resolvable:$true] %s43_s0 }
   0xb   :  { %49 = dma.hbm_to_vmem [thread:$0]  %s42_s27, 32, %s44_s0, [#allocation6], %s1258_s29, %s1258_s29, %s1259_s30  }
   0xc   :  { %1245 = dma.done.wait [#allocation3], 8192  }
   0xd   :  { %1246 = vsyncadd [#allocation3], 4294959104 }
   0xe   :  { %1247 = dma.done.wait [#allocation6], 2080  }
   0xf   :  { %1248 = vsyncadd [#allocation6], 4294965216  ;;  %v1077_v0 = vld [vmem:[#allocation5 + $0x38] sm:$0xff]  ;;  %v1076_v1 = vld [vmem:[#allocation5 + $0x30] sm:$0xff]  ;;  %s1260_s2 = smov [#allocation8]   ;;  %s992_s7 = sshll.u32 %s1550_s3, 4  ;;  %s993_s7 = int_to_ptr.hbm [resolvable:$true] %s992_s7 }
  0x10   :  { %226 = vmatpush.bf16.msra.mxu0 %v1077_v0  ;;  %1086 = vmatpush.bf16.msra.mxu2 %v1077_v0  ;;  %v1075_v2 = vld [vmem:[#allocation5 + $0x28] sm:$0xff]  ;;  %v1074_v3 = vld [vmem:[#allocation5 + $0x20] sm:$0xff]  ;;  %v1073_v4 = vld [vmem:[#allocation5 + $0x18] sm:$0xff]  ;;  %s990_s4 = sshll.u32 %s1260_s2, 4  ;;  %s991_s4 = int_to_ptr.vmem [resolvable:$true] %s990_s4 }
  0x11   :  { %v1072_v5 = vld [vmem:[#allocation5 + $0x10] sm:$0xff]  ;;  %v1071_v6 = vld [vmem:[#allocation5 + $0x8] sm:$0xff]  ;;  %v1070_v7 = vld [vmem:[#allocation5] sm:$0xff] }
  0x12   :  { %v1293_v8 = vld [vmem:[#allocation2] sm:$0xff]  ;;  %v1295_v9 = vld [vmem:[#allocation2 + $0x8] sm:$0xff]  ;;  %v1305_v14 = vld [vmem:[#allocation2 + $0x10] sm:$0xff] }
  0x13   :  { %v1297_v10 = vld [vmem:[#allocation2 + $0x100] sm:$0xff]  ;;  %v1299_v11 = vld [vmem:[#allocation2 + $0x108] sm:$0xff]  ;;  %v126_v12 = vpack.c.bf16 %v1295_v9, %v1293_v8  ;;  %v1307_v15 = vld [vmem:[#allocation2 + $0x18] sm:$0xff] }
  0x14   :  { %227 = vmatpush.bf16.msra.mxu0 %v1076_v1  ;;  %1087 = vmatpush.bf16.msra.mxu2 %v1076_v1  ;;  %v142_v13 = vpack.c.bf16 %v1299_v11, %v1297_v10  ;;  %v1309_v16 = vld [vmem:[#allocation2 + $0x110] sm:$0xff]  ;;  %v1311_v17 = vld [vmem:[#allocation2 + $0x118] sm:$0xff]  ;;  %v127_v18 = vpack.c.bf16 %v1307_v15, %v1305_v14  ;;  %v1317_v20 = vld [vmem:[#allocation2 + $0x20] sm:$0xff] }
  0x15   :  { %v143_v19 = vpack.c.bf16 %v1311_v17, %v1309_v16  ;;  %v1319_v21 = vld [vmem:[#allocation2 + $0x28] sm:$0xff]  ;;  %v1321_v22 = vld [vmem:[#allocation2 + $0x120] sm:$0xff]  ;;  %v1329_v26 = vld [vmem:[#allocation2 + $0x30] sm:$0xff] }
  0x16   :  { %v1323_v23 = vld [vmem:[#allocation2 + $0x128] sm:$0xff]  ;;  %v128_v24 = vpack.c.bf16 %v1319_v21, %v1317_v20  ;;  %v1331_v27 = vld [vmem:[#allocation2 + $0x38] sm:$0xff]  ;;  %v1333_v28 = vld [vmem:[#allocation2 + $0x130] sm:$0xff] }
  0x17   :  { %v144_v25 = vpack.c.bf16 %v1323_v23, %v1321_v22  ;;  %v1335_v29 = vld [vmem:[#allocation2 + $0x138] sm:$0xff]  ;;  %v129_v30 = vpack.c.bf16 %v1331_v27, %v1329_v26  ;;  %v1341_v32 = vld [vmem:[#allocation2 + $0x40] sm:$0xff]  ;;  %v1343_v33 = vld [vmem:[#allocation2 + $0x48] sm:$0xff] }
  0x18   :  { %228 = vmatpush.bf16.msra.mxu0 %v1075_v2  ;;  %1088 = vmatpush.bf16.msra.mxu2 %v1075_v2  ;;  %v145_v31 = vpack.c.bf16 %v1335_v29, %v1333_v28  ;;  %v1345_v34 = vld [vmem:[#allocation2 + $0x140] sm:$0xff]  ;;  %v1347_v35 = vld [vmem:[#allocation2 + $0x148] sm:$0xff]  ;;  %v130_v36 = vpack.c.bf16 %v1343_v33, %v1341_v32  ;;  %v1085_v38 = vld [vmem:[#allocation5 + $0x78] sm:$0xff] }
  0x19   :  { %v146_v37 = vpack.c.bf16 %v1347_v35, %v1345_v34  ;;  %561 = vmatpush.bf16.msra.mxu1 %v1085_v38  ;;  %1094 = vmatpush.bf16.msra.mxu3 %v1085_v38  ;;  %v1353_v39 = vld [vmem:[#allocation2 + $0x50] sm:$0xff]  ;;  %v1355_v40 = vld [vmem:[#allocation2 + $0x58] sm:$0xff]  ;;  %v1083_v46 = vld [vmem:[#allocation5 + $0x68] sm:$0xff] }
  0x1a   :  { %v1357_v41 = vld [vmem:[#allocation2 + $0x150] sm:$0xff]  ;;  %v1359_v42 = vld [vmem:[#allocation2 + $0x158] sm:$0xff]  ;;  %v131_v43 = vpack.c.bf16 %v1355_v40, %v1353_v39  ;;  %v1082_v47 = vld [vmem:[#allocation5 + $0x60] sm:$0xff] }
  0x1b   :  { %v147_v44 = vpack.c.bf16 %v1359_v42, %v1357_v41  ;;  %v1084_v45 = vld [vmem:[#allocation5 + $0x70] sm:$0xff]  ;;  %v1365_v48 = vld [vmem:[#allocation2 + $0x60] sm:$0xff]  ;;  %v1367_v49 = vld [vmem:[#allocation2 + $0x68] sm:$0xff] }
  0x1c   :  { %229 = vmatpush.bf16.msra.mxu0 %v1074_v3  ;;  %1089 = vmatpush.bf16.msra.mxu2 %v1074_v3  ;;  %v1369_v50 = vld [vmem:[#allocation2 + $0x160] sm:$0xff]  ;;  %v107_v51 = vld [vmem:[#allocation2 + $0x168] sm:$0xff]  ;;  %v1081_v52 = vld [vmem:[#allocation5 + $0x58] sm:$0xff]  ;;  %v132_v53 = vpack.c.bf16 %v1367_v49, %v1365_v48 }
  0x1d   :  { %562 = vmatpush.bf16.msra.mxu1 %v1084_v45  ;;  %1095 = vmatpush.bf16.msra.mxu3 %v1084_v45  ;;  %v148_v54 = vpack.c.bf16 %v107_v51, %v1369_v50  ;;  %v1080_v55 = vld [vmem:[#allocation5 + $0x50] sm:$0xff]  ;;  %v1079_v56 = vld [vmem:[#allocation5 + $0x48] sm:$0xff]  ;;  %v1078_v57 = vld [vmem:[#allocation5 + $0x40] sm:$0xff] }
  0x1e   :  { %v1374_v58 = vld [vmem:[#allocation2 + $0x70] sm:$0xff]  ;;  %v1376_v59 = vld [vmem:[#allocation2 + $0x78] sm:$0xff]  ;;  %v78_v0 = vld [vmem:[#allocation2 + $0x80] sm:$0xff] }
  0x1f   :  { %v108_v60 = vld [vmem:[#allocation2 + $0x170] sm:$0xff]  ;;  %v109_v61 = vld [vmem:[#allocation2 + $0x178] sm:$0xff]  ;;  %v133_v62 = vpack.c.bf16 %v1376_v59, %v1374_v58  ;;  %v79_v1 = vld [vmem:[#allocation2 + $0x88] sm:$0xff] }
  0x20   :  { %230 = vmatpush.bf16.msra.mxu0 %v1073_v4  ;;  %1090 = vmatpush.bf16.msra.mxu2 %v1073_v4  ;;  %v149_v63 = vpack.c.bf16 %v109_v61, %v108_v60  ;;  %v110_v2 = vld [vmem:[#allocation2 + $0x180] sm:$0xff]  ;;  %v111_v3 = vld [vmem:[#allocation2 + $0x188] sm:$0xff]  ;;  %v134_v4 = vpack.c.bf16 %v79_v1, %v78_v0 }
  0x21   :  { %563 = vmatpush.bf16.msra.mxu1 %v1083_v46  ;;  %1096 = vmatpush.bf16.msra.mxu3 %v1083_v46  ;;  %v83_v0 = vld [vmem:[#allocation2 + $0xa8] sm:$0xff]  ;;  %v114_v1 = vld [vmem:[#allocation2 + $0x1a0] sm:$0xff] }
  0x24   :  { %231 = vmatpush.bf16.msra.mxu0 %v1072_v5  ;;  %1091 = vmatpush.bf16.msra.mxu2 %v1072_v5  ;;  %v150_v5 = vpack.c.bf16 %v111_v3, %v110_v2  ;;  %v115_v2 = vld [vmem:[#allocation2 + $0x1a8] sm:$0xff] }
  0x25   :  { %564 = vmatpush.bf16.msra.mxu1 %v1082_v47  ;;  %1097 = vmatpush.bf16.msra.mxu3 %v1082_v47 }
  0x28   :  { %232 = vmatpush.bf16.msra.mxu0 %v1071_v6  ;;  %1092 = vmatpush.bf16.msra.mxu2 %v1071_v6 }
  0x29   :  { %565 = vmatpush.bf16.msra.mxu1 %v1081_v52  ;;  %1098 = vmatpush.bf16.msra.mxu3 %v1081_v52 }
  0x2c   :  { %233 = vmatpush.bf16.msra.mxu0 %v1070_v7  ;;  %1093 = vmatpush.bf16.msra.mxu2 %v1070_v7  ;;  %v1380_v7 = vld [vmem:[#allocation7] ss:$0 sm:$0xff] }
  0x2d   :  { %566 = vmatpush.bf16.msra.mxu1 %v1080_v55  ;;  %1099 = vmatpush.bf16.msra.mxu3 %v1080_v55 }
  0x2f   :  { %234 = vmatmul.bf16.vlgmr.msra.gmra.mxu0 %v126_v12  ;;  %314 = vmatmul.bf16.vlgmr.msra.gmra.mxu2 %v142_v13 }
  0x31   :  { %567 = vmatpush.bf16.msra.mxu1 %v1079_v56  ;;  %1100 = vmatpush.bf16.msra.mxu3 %v1079_v56 }
  0x35   :  { %568 = vmatpush.bf16.msra.mxu1 %v1078_v57  ;;  %1101 = vmatpush.bf16.msra.mxu3 %v1078_v57 }
  0x3f   :  { %239 = vmatmul.bf16.gmra.mxu0 %v127_v18  ;;  %319 = vmatmul.bf16.gmra.mxu2 %v143_v19 }
  0x4f   :  { %244 = vmatmul.bf16.gmra.mxu0 %v128_v24  ;;  %324 = vmatmul.bf16.gmra.mxu2 %v144_v25 }
  0x5f   :  { %249 = vmatmul.bf16.gmra.mxu0 %v129_v30  ;;  %329 = vmatmul.bf16.gmra.mxu2 %v145_v31  ;;  %v80_v30 = vld [vmem:[#allocation2 + $0x90] sm:$0xff]  ;;  %v81_v31 = vld [vmem:[#allocation2 + $0x98] sm:$0xff] }
  0x60   :  { %v135_v46 = vpack.c.bf16 %v81_v31, %v80_v30 }
  0x6f   :  { %254 = vmatmul.bf16.gmra.mxu0 %v130_v36  ;;  %334 = vmatmul.bf16.gmra.mxu2 %v146_v37  ;;  %v112_v36 = vld [vmem:[#allocation2 + $0x190] sm:$0xff]  ;;  %v113_v37 = vld [vmem:[#allocation2 + $0x198] sm:$0xff] }
  0x70   :  { %v151_v47 = vpack.c.bf16 %v113_v37, %v112_v36 }
  0x7f   :  { %259 = vmatmul.bf16.gmra.mxu0 %v131_v43  ;;  %339 = vmatmul.bf16.gmra.mxu2 %v147_v44 }
  0x8f   :  { %264 = vmatmul.bf16.gmra.mxu0 %v132_v53  ;;  %344 = vmatmul.bf16.gmra.mxu2 %v148_v54 }
  0x9f   :  { %269 = vmatmul.bf16.gmra.mxu0 %v133_v62  ;;  %349 = vmatmul.bf16.gmra.mxu2 %v149_v63  ;;  %v82_v63 = vld [vmem:[#allocation2 + $0xa0] sm:$0xff] }
  0xac   :  { %v235_v6 = vpop.f32.mrf.mxu0 }
  0xad   :  { %v236_v12 = vadd.f32 %v1380_v7, %v235_v6 }
  0xaf   :  { %274 = vmatmul.bf16.gmra.mxu0 %v134_v4  ;;  %354 = vmatmul.bf16.gmra.mxu2 %v150_v5  ;;  %v395_v19 = vmax.f32 %v236_v12, 0.0  ;;  %v136_v12 = vpack.c.bf16 %v83_v0, %v82_v63 }
  0xb2   :  { %v315_v13 = vpop.f32.mrf.mxu2 }
  0xb3   :  { %v316_v38 = vadd.f32 %v1380_v7, %v315_v13  ;;  %v152_v13 = vpack.c.bf16 %v115_v2, %v114_v1 }
  0xb4   :  { %v237_v18 = vpop.f32.mrf.mxu0 }
  0xb5   :  { %v238_v24 = vadd.f32 %v1380_v7, %v237_v18  ;;  %v427_v52 = vmax.f32 %v316_v38, 0.0 }
  0xb7   :  { %v396_v25 = vmax.f32 %v238_v24, 0.0 }
  0xb9   :  { %v459_v43 = vpack.c.bf16 %v396_v25, %v395_v19 }
  0xba   :  { %v317_v44 = vpop.f32.mrf.mxu2 }
  0xbb   :  { %v318_v45 = vadd.f32 %v1380_v7, %v317_v44  ;;  %569 = vmatmul.bf16.vlgmr.msra.gmra.mxu1 %v459_v43  ;;  %v84_v44 = vld [vmem:[#allocation2 + $0xb0] sm:$0xff] }
  0xbc   :  { %v240_v51 = vpop.f32.mrf.mxu0 }
  0xbd   :  { %v428_v53 = vmax.f32 %v318_v45, 0.0  ;;  %v241_v55 = vadd.f32 %v1380_v7, %v240_v51  ;;  %v85_v45 = vld [vmem:[#allocation2 + $0xb8] sm:$0xff] }
  0xbf   :  { %279 = vmatmul.bf16.gmra.mxu0 %v135_v46  ;;  %359 = vmatmul.bf16.gmra.mxu2 %v151_v47  ;;  %v475_v54 = vpack.c.bf16 %v428_v53, %v427_v52  ;;  %v397_v60 = vmax.f32 %v241_v55, 0.0  ;;  %v116_v46 = vld [vmem:[#allocation2 + $0x1b0] sm:$0xff]  ;;  %v117_v47 = vld [vmem:[#allocation2 + $0x1b8] sm:$0xff]  ;;  %v137_v55 = vpack.c.bf16 %v85_v45, %v84_v44 }
  0xc1   :  { %649 = vmatmul.bf16.vlgmr.msra.gmra.mxu3 %v475_v54 }
  0xc2   :  { %v320_v56 = vpop.f32.mrf.mxu2 }
  0xc3   :  { %v321_v3 = vadd.f32 %v1380_v7, %v320_v56  ;;  %v153_v56 = vpack.c.bf16 %v117_v47, %v116_v46 }
  0xc4   :  { %v242_v57 = vpop.f32.mrf.mxu0 }
  0xc5   :  { %v243_v61 = vadd.f32 %v1380_v7, %v242_v57  ;;  %v429_v19 = vmax.f32 %v321_v3, 0.0 }
  0xc7   :  { %v398_v62 = vmax.f32 %v243_v61, 0.0 }
  0xc9   :  { %v460_v4 = vpack.c.bf16 %v398_v62, %v397_v60 }
  0xca   :  { %v322_v5 = vpop.f32.mrf.mxu2 }
  0xcb   :  { %v323_v6 = vadd.f32 %v1380_v7, %v322_v5  ;;  %574 = vmatmul.bf16.gmra.mxu1 %v460_v4  ;;  %v86_v5 = vld [vmem:[#allocation2 + $0xc0] sm:$0xff] }
  0xcc   :  { %v245_v18 = vpop.f32.mrf.mxu0 }
  0xcd   :  { %v430_v24 = vmax.f32 %v323_v6, 0.0  ;;  %v246_v30 = vadd.f32 %v1380_v7, %v245_v18  ;;  %v87_v6 = vld [vmem:[#allocation2 + $0xc8] sm:$0xff] }
  0xcf   :  { %284 = vmatmul.bf16.gmra.mxu0 %v136_v12  ;;  %364 = vmatmul.bf16.gmra.mxu2 %v152_v13  ;;  %v476_v25 = vpack.c.bf16 %v430_v24, %v429_v19  ;;  %v399_v37 = vmax.f32 %v246_v30, 0.0  ;;  %v118_v12 = vld [vmem:[#allocation2 + $0x1c0] sm:$0xff]  ;;  %v119_v13 = vld [vmem:[#allocation2 + $0x1c8] sm:$0xff]  ;;  %v138_v30 = vpack.c.bf16 %v87_v6, %v86_v5 }
  0xd1   :  { %654 = vmatmul.bf16.gmra.mxu3 %v476_v25 }
  0xd2   :  { %v325_v31 = vpop.f32.mrf.mxu2 }
  0xd3   :  { %v326_v51 = vadd.f32 %v1380_v7, %v325_v31  ;;  %v154_v31 = vpack.c.bf16 %v119_v13, %v118_v12 }
  0xd4   :  { %v247_v36 = vpop.f32.mrf.mxu0 }
  0xd5   :  { %v248_v38 = vadd.f32 %v1380_v7, %v247_v36  ;;  %v431_v60 = vmax.f32 %v326_v51, 0.0 }
  0xd7   :  { %v400_v43 = vmax.f32 %v248_v38, 0.0 }
  0xd9   :  { %v461_v52 = vpack.c.bf16 %v400_v43, %v399_v37 }
  0xda   :  { %v327_v53 = vpop.f32.mrf.mxu2 }
  0xdb   :  { %v328_v54 = vadd.f32 %v1380_v7, %v327_v53  ;;  %579 = vmatmul.bf16.gmra.mxu1 %v461_v52  ;;  %v88_v53 = vld [vmem:[#allocation2 + $0xd0] sm:$0xff] }
  0xdc   :  { %v250_v57 = vpop.f32.mrf.mxu0 }
  0xdd   :  { %v432_v61 = vmax.f32 %v328_v54, 0.0  ;;  %v251_v63 = vadd.f32 %v1380_v7, %v250_v57  ;;  %v89_v54 = vld [vmem:[#allocation2 + $0xd8] sm:$0xff] }
  0xdf   :  { %289 = vmatmul.bf16.gmra.mxu0 %v137_v55  ;;  %369 = vmatmul.bf16.gmra.mxu2 %v153_v56  ;;  %v477_v62 = vpack.c.bf16 %v432_v61, %v431_v60  ;;  %v401_v2 = vmax.f32 %v251_v63, 0.0  ;;  %v120_v55 = vld [vmem:[#allocation2 + $0x1d0] sm:$0xff]  ;;  %v121_v56 = vld [vmem:[#allocation2 + $0x1d8] sm:$0xff]  ;;  %v139_v63 = vpack.c.bf16 %v89_v54, %v88_v53 }
  0xe1   :  { %659 = vmatmul.bf16.gmra.mxu3 %v477_v62 }
  0xe2   :  { %v330_v0 = vpop.f32.mrf.mxu2 }
  0xe3   :  { %v331_v18 = vadd.f32 %v1380_v7, %v330_v0  ;;  %v155_v0 = vpack.c.bf16 %v121_v56, %v120_v55 }
  0xe4   :  { %v252_v1 = vpop.f32.mrf.mxu0 }
  0xe5   :  { %v253_v3 = vadd.f32 %v1380_v7, %v252_v1  ;;  %v433_v37 = vmax.f32 %v331_v18, 0.0 }
  0xe7   :  { %v402_v4 = vmax.f32 %v253_v3, 0.0 }
  0xe9   :  { %v462_v19 = vpack.c.bf16 %v402_v4, %v401_v2 }
  0xea   :  { %v332_v24 = vpop.f32.mrf.mxu2 }
  0xeb   :  { %v333_v25 = vadd.f32 %v1380_v7, %v332_v24  ;;  %584 = vmatmul.bf16.gmra.mxu1 %v462_v19  ;;  %v90_v24 = vld [vmem:[#allocation2 + $0xe0] sm:$0xff] }
  0xec   :  { %v255_v36 = vpop.f32.mrf.mxu0 }
  0xed   :  { %v434_v38 = vmax.f32 %v333_v25, 0.0  ;;  %v256_v44 = vadd.f32 %v1380_v7, %v255_v36  ;;  %v91_v25 = vld [vmem:[#allocation2 + $0xe8] sm:$0xff] }
  0xef   :  { %294 = vmatmul.bf16.gmra.mxu0 %v138_v30  ;;  %374 = vmatmul.bf16.gmra.mxu2 %v154_v31  ;;  %v478_v43 = vpack.c.bf16 %v434_v38, %v433_v37  ;;  %v403_v47 = vmax.f32 %v256_v44, 0.0  ;;  %v122_v30 = vld [vmem:[#allocation2 + $0x1e0] sm:$0xff]  ;;  %v123_v31 = vld [vmem:[#allocation2 + $0x1e8] sm:$0xff]  ;;  %v140_v44 = vpack.c.bf16 %v91_v25, %v90_v24 }
  0xf1   :  { %664 = vmatmul.bf16.gmra.mxu3 %v478_v43 }
  0xf2   :  { %v335_v45 = vpop.f32.mrf.mxu2 }
  0xf3   :  { %v336_v57 = vadd.f32 %v1380_v7, %v335_v45  ;;  %v156_v45 = vpack.c.bf16 %v123_v31, %v122_v30 }
  0xf4   :  { %v257_v46 = vpop.f32.mrf.mxu0 }
  0xf5   :  { %v258_v51 = vadd.f32 %v1380_v7, %v257_v46  ;;  %v435_v2 = vmax.f32 %v336_v57, 0.0 }
  0xf7   :  { %v404_v52 = vmax.f32 %v258_v51, 0.0 }
  0xf9   :  { %v463_v60 = vpack.c.bf16 %v404_v52, %v403_v47 }
  0xfa   :  { %v337_v61 = vpop.f32.mrf.mxu2 }
  0xfb   :  { %v338_v62 = vadd.f32 %v1380_v7, %v337_v61  ;;  %589 = vmatmul.bf16.gmra.mxu1 %v463_v60  ;;  %v92_v61 = vld [vmem:[#allocation2 + $0xf0] sm:$0xff] }
  0xfc   :  { %v260_v1 = vpop.f32.mrf.mxu0 }
  0xfd   :  { %v436_v3 = vmax.f32 %v338_v62, 0.0  ;;  %v261_v5 = vadd.f32 %v1380_v7, %v260_v1  ;;  %v93_v62 = vld [vmem:[#allocation2 + $0xf8] sm:$0xff] }
  0xff   :  { %299 = vmatmul.bf16.gmra.mxu0 %v139_v63  ;;  %379 = vmatmul.bf16.gmra.mxu2 %v155_v0  ;;  %v479_v4 = vpack.c.bf16 %v436_v3, %v435_v2  ;;  %v405_v13 = vmax.f32 %v261_v5, 0.0  ;;  %v124_v63 = vld [vmem:[#allocation2 + $0x1f0] sm:$0xff]  ;;  %v125_v0 = vld [vmem:[#allocation2 + $0x1f8] sm:$0xff]  ;;  %v141_v5 = vpack.c.bf16 %v93_v62, %v92_v61 }
 0x101   :  { %669 = vmatmul.bf16.gmra.mxu3 %v479_v4 }
 0x102   :  { %v340_v6 = vpop.f32.mrf.mxu2 }
 0x103   :  { %v341_v36 = vadd.f32 %v1380_v7, %v340_v6  ;;  %v157_v6 = vpack.c.bf16 %v125_v0, %v124_v63 }
 0x104   :  { %v262_v12 = vpop.f32.mrf.mxu0 }
 0x105   :  { %v263_v18 = vadd.f32 %v1380_v7, %v262_v12  ;;  %v437_v47 = vmax.f32 %v341_v36, 0.0 }
 0x107   :  { %v406_v19 = vmax.f32 %v263_v18, 0.0 }
 0x109   :  { %v464_v37 = vpack.c.bf16 %v406_v19, %v405_v13 }
 0x10a   :  { %v342_v38 = vpop.f32.mrf.mxu2 }
 0x10b   :  { %v343_v43 = vadd.f32 %v1380_v7, %v342_v38  ;;  %594 = vmatmul.bf16.gmra.mxu1 %v464_v37 }
 0x10c   :  { %v265_v46 = vpop.f32.mrf.mxu0 }
 0x10d   :  { %v438_v51 = vmax.f32 %v343_v43, 0.0  ;;  %v266_v53 = vadd.f32 %v1380_v7, %v265_v46 }
 0x10f   :  { %304 = vmatmul.bf16.gmra.mxu0 %v140_v44  ;;  %384 = vmatmul.bf16.gmra.mxu2 %v156_v45  ;;  %v480_v52 = vpack.c.bf16 %v438_v51, %v437_v47  ;;  %v407_v56 = vmax.f32 %v266_v53, 0.0 }
 0x111   :  { %674 = vmatmul.bf16.gmra.mxu3 %v480_v52 }
 0x112   :  { %v345_v54 = vpop.f32.mrf.mxu2 }
 0x113   :  { %v346_v1 = vadd.f32 %v1380_v7, %v345_v54 }
 0x114   :  { %v267_v55 = vpop.f32.mrf.mxu0 }
 0x115   :  { %v268_v57 = vadd.f32 %v1380_v7, %v267_v55  ;;  %v439_v13 = vmax.f32 %v346_v1, 0.0 }
 0x117   :  { %v408_v60 = vmax.f32 %v268_v57, 0.0 }
 0x119   :  { %v465_v2 = vpack.c.bf16 %v408_v60, %v407_v56  ;;  %v1416_v60 = vld [vmem:[#allocation7 + $0x1] ss:$0 sm:$0xff] }
 0x11a   :  { %v347_v3 = vpop.f32.mrf.mxu2 }
 0x11b   :  { %v348_v4 = vadd.f32 %v1380_v7, %v347_v3  ;;  %599 = vmatmul.bf16.gmra.mxu1 %v465_v2 }
 0x11c   :  { %v270_v12 = vpop.f32.mrf.mxu0 }
 0x11d   :  { %v440_v18 = vmax.f32 %v348_v4, 0.0  ;;  %v271_v24 = vadd.f32 %v1380_v7, %v270_v12 }
 0x11f   :  { %309 = vmatmul.bf16.gmra.mxu0 %v141_v5  ;;  %389 = vmatmul.bf16.gmra.mxu2 %v157_v6  ;;  %v481_v19 = vpack.c.bf16 %v440_v18, %v439_v13  ;;  %v409_v31 = vmax.f32 %v271_v24, 0.0 }
 0x121   :  { %679 = vmatmul.bf16.gmra.mxu3 %v481_v19 }
 0x122   :  { %v350_v25 = vpop.f32.mrf.mxu2 }
 0x123   :  { %v351_v38 = vadd.f32 %v1380_v7, %v350_v25 }
 0x124   :  { %v272_v30 = vpop.f32.mrf.mxu0 }
 0x125   :  { %v273_v36 = vadd.f32 %v1380_v7, %v272_v30  ;;  %v441_v47 = vmax.f32 %v351_v38, 0.0 }
 0x127   :  { %v410_v37 = vmax.f32 %v273_v36, 0.0 }
 0x129   :  { %v466_v43 = vpack.c.bf16 %v410_v37, %v409_v31 }
 0x12a   :  { %v352_v44 = vpop.f32.mrf.mxu2 }
 0x12b   :  { %v353_v45 = vadd.f32 %v1380_v7, %v352_v44  ;;  %604 = vmatmul.bf16.gmra.mxu1 %v466_v43 }
 0x12c   :  { %v275_v46 = vpop.f32.mrf.mxu0 }
 0x12d   :  { %v442_v51 = vmax.f32 %v353_v45, 0.0  ;;  %v276_v53 = vadd.f32 %v1380_v7, %v275_v46 }
 0x12f   :  { %v482_v52 = vpack.c.bf16 %v442_v51, %v441_v47  ;;  %v411_v56 = vmax.f32 %v276_v53, 0.0 }
 0x131   :  { %684 = vmatmul.bf16.gmra.mxu3 %v482_v52 }
 0x132   :  { %v355_v54 = vpop.f32.mrf.mxu2 }
 0x133   :  { %v356_v63 = vadd.f32 %v1380_v7, %v355_v54 }
 0x134   :  { %v277_v55 = vpop.f32.mrf.mxu0 }
 0x135   :  { %v278_v57 = vadd.f32 %v1380_v7, %v277_v55  ;;  %v443_v6 = vmax.f32 %v356_v63, 0.0 }
 0x137   :  { %v412_v61 = vmax.f32 %v278_v57, 0.0 }
 0x138   :  { %v570_v62 = vpop.f32.mrf.mxu1 }
 0x139   :  { %v571_v0 = vadd.f32 %v1416_v60, %v570_v62  ;;  %v467_v1 = vpack.c.bf16 %v412_v61, %v411_v56 }
 0x13a   :  { %v357_v2 = vpop.f32.mrf.mxu2 }
 0x13b   :  { %v730_v3 = vmax.f32 %v571_v0, 0.0  ;;  %v358_v4 = vadd.f32 %v1380_v7, %v357_v2  ;;  %609 = vmatmul.bf16.gmra.mxu1 %v467_v1 }
 0x13c   :  { %v280_v5 = vpop.f32.mrf.mxu0 }
 0x13d   :  { %vm794_vm0 = vcmp.ge.f32.partialorder %v730_v3, 0.0  ;;  %v444_v12 = vmax.f32 %v358_v4, 0.0  ;;  %v281_v24 = vadd.f32 %v1380_v7, %v280_v5 }
 0x13e   :  { %v858_v13 = vsel %vm794_vm0, %v1293_v8, 0.0 }
 0x13f   :  { %922 = vst [vmem:[#allocation8] sm:$0xff] %v858_v13  ;;  %v483_v18 = vpack.c.bf16 %v444_v12, %v443_v6  ;;  %v413_v38 = vmax.f32 %v281_v24, 0.0 }
 0x140   :  { %v572_v19 = vpop.f32.mrf.mxu1 }
 0x141   :  { %v573_v25 = vadd.f32 %v1416_v60, %v572_v19  ;;  %689 = vmatmul.bf16.gmra.mxu3 %v483_v18 }
 0x142   :  { %v360_v30 = vpop.f32.mrf.mxu2 }
 0x143   :  { %v731_v31 = vmax.f32 %v573_v25, 0.0  ;;  %v361_v51 = vadd.f32 %v1380_v7, %v360_v30 }
 0x144   :  { %v282_v36 = vpop.f32.mrf.mxu0  ;;  %v650_v37 = vpop.f32.mrf.mxu3 }
 0x145   :  { %vm795_vm1 = vcmp.ge.f32.partialorder %v731_v31, 0.0  ;;  %v283_v43 = vadd.f32 %v1380_v7, %v282_v36  ;;  %v651_v44 = vadd.f32 %v1416_v60, %v650_v37  ;;  %v445_v62 = vmax.f32 %v361_v51, 0.0 }
 0x146   :  { %v859_v8 = vsel %vm795_vm1, %v1295_v9, 0.0 }
 0x147   :  { %923 = vst [vmem:[#allocation8 + $0x8] sm:$0xff] %v859_v8  ;;  %v414_v45 = vmax.f32 %v283_v43, 0.0  ;;  %v762_v46 = vmax.f32 %v651_v44, 0.0 }
 0x148   :  { %v575_v47 = vpop.f32.mrf.mxu1 }
 0x149   :  { %vm826_vm2 = vcmp.ge.f32.partialorder %v762_v46, 0.0  ;;  %v576_v52 = vadd.f32 %v1416_v60, %v575_v47  ;;  %v468_v53 = vpack.c.bf16 %v414_v45, %v413_v38 }
 0x14a   :  { %v890_v54 = vsel %vm826_vm2, %v1297_v10, 0.0  ;;  %v362_v55 = vpop.f32.mrf.mxu2 }
 0x14b   :  { %954 = vst [vmem:[#allocation8 + $0x100] sm:$0xff] %v890_v54  ;;  %v732_v56 = vmax.f32 %v576_v52, 0.0  ;;  %v363_v57 = vadd.f32 %v1380_v7, %v362_v55  ;;  %614 = vmatmul.bf16.gmra.mxu1 %v468_v53 }
 0x14c   :  { %v285_v61 = vpop.f32.mrf.mxu0  ;;  %v652_v9 = vpop.f32.mrf.mxu3 }
 0x14d   :  { %vm796_vm3 = vcmp.ge.f32.partialorder %v732_v56, 0.0  ;;  %v446_v63 = vmax.f32 %v363_v57, 0.0  ;;  %v653_v0 = vadd.f32 %v1416_v60, %v652_v9  ;;  %v286_v10 = vadd.f32 %v1380_v7, %v285_v61 }
 0x14e   :  { %v860_v1 = vsel %vm796_vm3, %v1305_v14, 0.0 }
 0x14f   :  { %924 = vst [vmem:[#allocation8 + $0x10] sm:$0xff] %v860_v1  ;;  %v763_v2 = vmax.f32 %v653_v0, 0.0  ;;  %v484_v3 = vpack.c.bf16 %v446_v63, %v445_v62  ;;  %v415_v24 = vmax.f32 %v286_v10, 0.0 }
 0x150   :  { %v577_v4 = vpop.f32.mrf.mxu1 }
 0x151   :  { %vm827_vm4 = vcmp.ge.f32.partialorder %v763_v2, 0.0  ;;  %v578_v5 = vadd.f32 %v1416_v60, %v577_v4  ;;  %694 = vmatmul.bf16.gmra.mxu3 %v484_v3 }
 0x152   :  { %v891_v6 = vsel %vm827_vm4, %v1299_v11, 0.0  ;;  %v365_v12 = vpop.f32.mrf.mxu2 }
 0x153   :  { %955 = vst [vmem:[#allocation8 + $0x108] sm:$0xff] %v891_v6  ;;  %v733_v13 = vmax.f32 %v578_v5, 0.0  ;;  %v366_v38 = vadd.f32 %v1380_v7, %v365_v12 }
 0x154   :  { %v287_v18 = vpop.f32.mrf.mxu0  ;;  %v655_v19 = vpop.f32.mrf.mxu3 }
 0x155   :  { %vm797_vm5 = vcmp.ge.f32.partialorder %v733_v13, 0.0  ;;  %v288_v14 = vadd.f32 %v1380_v7, %v287_v18  ;;  %v656_v25 = vadd.f32 %v1416_v60, %v655_v19  ;;  %v447_v51 = vmax.f32 %v366_v38, 0.0 }
 0x156   :  { %v861_v30 = vsel %vm797_vm5, %v1307_v15, 0.0 }
 0x157   :  { %925 = vst [vmem:[#allocation8 + $0x18] sm:$0xff] %v861_v30  ;;  %v416_v31 = vmax.f32 %v288_v14, 0.0  ;;  %v764_v36 = vmax.f32 %v656_v25, 0.0 }
 0x158   :  { %v580_v37 = vpop.f32.mrf.mxu1 }
 0x159   :  { %vm828_vm6 = vcmp.ge.f32.partialorder %v764_v36, 0.0  ;;  %v581_v11 = vadd.f32 %v1416_v60, %v580_v37  ;;  %v469_v43 = vpack.c.bf16 %v416_v31, %v415_v24 }
 0x15a   :  { %v892_v44 = vsel %vm828_vm6, %v1309_v16, 0.0  ;;  %v367_v8 = vpop.f32.mrf.mxu2 }
 0x15b   :  { %956 = vst [vmem:[#allocation8 + $0x110] sm:$0xff] %v892_v44  ;;  %v734_v45 = vmax.f32 %v581_v11, 0.0  ;;  %v368_v46 = vadd.f32 %v1380_v7, %v367_v8  ;;  %619 = vmatmul.bf16.gmra.mxu1 %v469_v43 }
 0x15c   :  { %v290_v47 = vpop.f32.mrf.mxu0  ;;  %v657_v15 = vpop.f32.mrf.mxu3 }
 0x15d   :  { %vm798_vm7 = vcmp.ge.f32.partialorder %v734_v45, 0.0  ;;  %v448_v52 = vmax.f32 %v368_v46, 0.0  ;;  %v658_v53 = vadd.f32 %v1416_v60, %v657_v15  ;;  %v291_v16 = vadd.f32 %v1380_v7, %v290_v47 }
 0x15e   :  { %v862_v54 = vsel %vm798_vm7, %v1317_v20, 0.0 }
 0x15f   :  { %926 = vst [vmem:[#allocation8 + $0x20] sm:$0xff] %v862_v54  ;;  %v765_v55 = vmax.f32 %v658_v53, 0.0  ;;  %v485_v56 = vpack.c.bf16 %v448_v52, %v447_v51  ;;  %v417_v2 = vmax.f32 %v291_v16, 0.0 }
 0x160   :  { %v582_v57 = vpop.f32.mrf.mxu1 }
 0x161   :  { %vm829_vm8 = vcmp.ge.f32.partialorder %v765_v55, 0.0  ;;  %v583_v61 = vadd.f32 %v1416_v60, %v582_v57  ;;  %699 = vmatmul.bf16.gmra.mxu3 %v485_v56 }
 0x162   :  { %v893_v9 = vsel %vm829_vm8, %v1311_v17, 0.0  ;;  %v370_v62 = vpop.f32.mrf.mxu2 }
 0x163   :  { %957 = vst [vmem:[#allocation8 + $0x118] sm:$0xff] %v893_v9  ;;  %v735_v63 = vmax.f32 %v583_v61, 0.0  ;;  %v371_v12 = vadd.f32 %v1380_v7, %v370_v62 }
 0x164   :  { %v292_v0 = vpop.f32.mrf.mxu0  ;;  %v660_v1 = vpop.f32.mrf.mxu3 }
 0x165   :  { %vm799_vm9 = vcmp.ge.f32.partialorder %v735_v63, 0.0  ;;  %v293_v20 = vadd.f32 %v1380_v7, %v292_v0  ;;  %v661_v3 = vadd.f32 %v1416_v60, %v660_v1  ;;  %v449_v30 = vmax.f32 %v371_v12, 0.0 }
 0x166   :  { %v863_v4 = vsel %vm799_vm9, %v1319_v21, 0.0 }
 0x167   :  { %927 = vst [vmem:[#allocation8 + $0x28] sm:$0xff] %v863_v4  ;;  %v418_v10 = vmax.f32 %v293_v20, 0.0  ;;  %v766_v5 = vmax.f32 %v661_v3, 0.0 }
 0x168   :  { %v585_v6 = vpop.f32.mrf.mxu1 }
 0x169   :  { %vm830_vm10 = vcmp.ge.f32.partialorder %v766_v5, 0.0  ;;  %v586_v17 = vadd.f32 %v1416_v60, %v585_v6  ;;  %v470_v13 = vpack.c.bf16 %v418_v10, %v417_v2 }
 0x16a   :  { %v894_v18 = vsel %vm830_vm10, %v1321_v22, 0.0  ;;  %v372_v19 = vpop.f32.mrf.mxu2 }
 0x16b   :  { %958 = vst [vmem:[#allocation8 + $0x120] sm:$0xff] %v894_v18  ;;  %v736_v24 = vmax.f32 %v586_v17, 0.0  ;;  %v373_v14 = vadd.f32 %v1380_v7, %v372_v19  ;;  %624 = vmatmul.bf16.gmra.mxu1 %v470_v13 }
 0x16c   :  { %v295_v25 = vpop.f32.mrf.mxu0  ;;  %v662_v21 = vpop.f32.mrf.mxu3 }
 0x16d   :  { %vm800_vm11 = vcmp.ge.f32.partialorder %v736_v24, 0.0  ;;  %v450_v31 = vmax.f32 %v373_v14, 0.0  ;;  %v663_v36 = vadd.f32 %v1416_v60, %v662_v21  ;;  %v296_v22 = vadd.f32 %v1380_v7, %v295_v25 }
 0x16e   :  { %v864_v37 = vsel %vm800_vm11, %v1329_v26, 0.0 }
 0x16f   :  { %928 = vst [vmem:[#allocation8 + $0x30] sm:$0xff] %v864_v37  ;;  %v767_v38 = vmax.f32 %v663_v36, 0.0  ;;  %v486_v11 = vpack.c.bf16 %v450_v31, %v449_v30  ;;  %v419_v51 = vmax.f32 %v296_v22, 0.0 }
 0x170   :  { %v587_v43 = vpop.f32.mrf.mxu1 }
 0x171   :  { %vm831_vm12 = vcmp.ge.f32.partialorder %v767_v38, 0.0  ;;  %v588_v44 = vadd.f32 %v1416_v60, %v587_v43  ;;  %704 = vmatmul.bf16.gmra.mxu3 %v486_v11 }
 0x172   :  { %v895_v8 = vsel %vm831_vm12, %v1323_v23, 0.0  ;;  %v375_v45 = vpop.f32.mrf.mxu2 }
 0x173   :  { %959 = vst [vmem:[#allocation8 + $0x128] sm:$0xff] %v895_v8  ;;  %v737_v46 = vmax.f32 %v588_v44, 0.0  ;;  %v376_v57 = vadd.f32 %v1380_v7, %v375_v45 }
 0x174   :  { %v297_v47 = vpop.f32.mrf.mxu0  ;;  %v665_v15 = vpop.f32.mrf.mxu3 }
 0x175   :  { %vm801_vm13 = vcmp.ge.f32.partialorder %v737_v46, 0.0  ;;  %v298_v26 = vadd.f32 %v1380_v7, %v297_v47  ;;  %v666_v52 = vadd.f32 %v1416_v60, %v665_v15  ;;  %v451_v1 = vmax.f32 %v376_v57, 0.0 }
 0x176   :  { %v865_v53 = vsel %vm801_vm13, %v1331_v27, 0.0 }
 0x177   :  { %929 = vst [vmem:[#allocation8 + $0x38] sm:$0xff] %v865_v53  ;;  %v420_v54 = vmax.f32 %v298_v26, 0.0  ;;  %v768_v55 = vmax.f32 %v666_v52, 0.0 }
 0x178   :  { %v590_v56 = vpop.f32.mrf.mxu1 }
 0x179   :  { %v471_v23 = vpack.c.bf16 %v420_v54, %v419_v51  ;;  %vm832_vm14 = vcmp.ge.f32.partialorder %v768_v55, 0.0  ;;  %v591_v16 = vadd.f32 %v1416_v60, %v590_v56 }
 0x17a   :  { %v896_v61 = vsel %vm832_vm14, %v1333_v28, 0.0  ;;  %v377_v9 = vpop.f32.mrf.mxu2 }
 0x17b   :  { %960 = vst [vmem:[#allocation8 + $0x130] sm:$0xff] %v896_v61  ;;  %v738_v62 = vmax.f32 %v591_v16, 0.0  ;;  %v378_v63 = vadd.f32 %v1380_v7, %v377_v9  ;;  %629 = vmatmul.bf16.gmra.mxu1 %v471_v23 }
 0x17c   :  { %v300_v0 = vpop.f32.mrf.mxu0  ;;  %v667_v27 = vpop.f32.mrf.mxu3 }
 0x17d   :  { %vm802_vm15 = vcmp.ge.f32.partialorder %v738_v62, 0.0  ;;  %v452_v2 = vmax.f32 %v378_v63, 0.0  ;;  %v668_v20 = vadd.f32 %v1416_v60, %v667_v27  ;;  %v301_v28 = vadd.f32 %v1380_v7, %v300_v0 }
 0x17e   :  { %v866_v3 = vsel %vm802_vm15, %v1341_v32, 0.0 }
 0x17f   :  { %930 = vst [vmem:[#allocation8 + $0x40] sm:$0xff] %v866_v3  ;;  %v487_v4 = vpack.c.bf16 %v452_v2, %v451_v1  ;;  %v769_v10 = vmax.f32 %v668_v20, 0.0  ;;  %v421_v24 = vmax.f32 %v301_v28, 0.0 }
 0x180   :  { %v592_v5 = vpop.f32.mrf.mxu1 }
 0x181   :  { %vm833_vm0 = vcmp.ge.f32.partialorder %v769_v10, 0.0  ;;  %v593_v6 = vadd.f32 %v1416_v60, %v592_v5  ;;  %709 = vmatmul.bf16.gmra.mxu3 %v487_v4 }
 0x182   :  { %v897_v12 = vsel %vm833_vm0, %v1335_v29, 0.0  ;;  %v380_v17 = vpop.f32.mrf.mxu2 }
 0x183   :  { %961 = vst [vmem:[#allocation8 + $0x138] sm:$0xff] %v897_v12  ;;  %v739_v13 = vmax.f32 %v593_v6, 0.0  ;;  %v381_v36 = vadd.f32 %v1380_v7, %v380_v17 }
 0x184   :  { %v302_v18 = vpop.f32.mrf.mxu0  ;;  %v670_v19 = vpop.f32.mrf.mxu3 }
 0x185   :  { %vm803_vm1 = vcmp.ge.f32.partialorder %v739_v13, 0.0  ;;  %v303_v32 = vadd.f32 %v1380_v7, %v302_v18  ;;  %v671_v14 = vadd.f32 %v1416_v60, %v670_v19  ;;  %v453_v8 = vmax.f32 %v381_v36, 0.0 }
 0x186   :  { %v867_v25 = vsel %vm803_vm1, %v1343_v33, 0.0 }
 0x187   :  { %931 = vst [vmem:[#allocation8 + $0x48] sm:$0xff] %v867_v25  ;;  %v422_v21 = vmax.f32 %v303_v32, 0.0  ;;  %v770_v30 = vmax.f32 %v671_v14, 0.0 }
 0x188   :  { %v595_v31 = vpop.f32.mrf.mxu1 }
 0x189   :  { %v472_v29 = vpack.c.bf16 %v422_v21, %v421_v24  ;;  %vm834_vm2 = vcmp.ge.f32.partialorder %v770_v30, 0.0  ;;  %v596_v37 = vadd.f32 %v1416_v60, %v595_v31 }
 0x18a   :  { %v898_v38 = vsel %vm834_vm2, %v1345_v34, 0.0  ;;  %v382_v11 = vpop.f32.mrf.mxu2 }
 0x18b   :  { %962 = vst [vmem:[#allocation8 + $0x140] sm:$0xff] %v898_v38  ;;  %v740_v43 = vmax.f32 %v596_v37, 0.0  ;;  %v383_v22 = vadd.f32 %v1380_v7, %v382_v11  ;;  %634 = vmatmul.bf16.gmra.mxu1 %v472_v29 }
 0x18c   :  { %v305_v44 = vpop.f32.mrf.mxu0  ;;  %v672_v33 = vpop.f32.mrf.mxu3 }
 0x18d   :  { %vm804_vm3 = vcmp.ge.f32.partialorder %v740_v43, 0.0  ;;  %v454_v45 = vmax.f32 %v383_v22, 0.0  ;;  %v673_v46 = vadd.f32 %v1416_v60, %v672_v33  ;;  %v306_v34 = vadd.f32 %v1380_v7, %v305_v44 }
 0x18e   :  { %v868_v47 = vsel %vm804_vm3, %v1353_v39, 0.0 }
 0x18f   :  { %932 = vst [vmem:[#allocation8 + $0x50] sm:$0xff] %v868_v47  ;;  %v488_v15 = vpack.c.bf16 %v454_v45, %v453_v8  ;;  %v771_v51 = vmax.f32 %v673_v46, 0.0  ;;  %v423_v23 = vmax.f32 %v306_v34, 0.0  ;;  %v1114_v34 = vld [vmem:[#allocation2 + $0x168] sm:$0xff] }
 0x190   :  { %v597_v26 = vpop.f32.mrf.mxu1 }
 0x191   :  { %vm835_vm4 = vcmp.ge.f32.partialorder %v771_v51, 0.0  ;;  %v598_v52 = vadd.f32 %v1416_v60, %v597_v26  ;;  %714 = vmatmul.bf16.gmra.mxu3 %v488_v15 }
 0x192   :  { %v899_v53 = vsel %vm835_vm4, %v1347_v35, 0.0  ;;  %v385_v54 = vpop.f32.mrf.mxu2 }
 0x193   :  { %963 = vst [vmem:[#allocation8 + $0x148] sm:$0xff] %v899_v53  ;;  %v741_v55 = vmax.f32 %v598_v52, 0.0  ;;  %v386_v0 = vadd.f32 %v1380_v7, %v385_v54 }
 0x194   :  { %v307_v56 = vpop.f32.mrf.mxu0  ;;  %v675_v57 = vpop.f32.mrf.mxu3 }
 0x195   :  { %vm805_vm5 = vcmp.ge.f32.partialorder %v741_v55, 0.0  ;;  %v308_v39 = vadd.f32 %v1380_v7, %v307_v56  ;;  %v676_v16 = vadd.f32 %v1416_v60, %v675_v57  ;;  %v455_v10 = vmax.f32 %v386_v0, 0.0 }
 0x196   :  { %v869_v61 = vsel %vm805_vm5, %v1355_v40, 0.0 }
 0x197   :  { %933 = vst [vmem:[#allocation8 + $0x58] sm:$0xff] %v869_v61  ;;  %v424_v9 = vmax.f32 %v308_v39, 0.0  ;;  %v772_v62 = vmax.f32 %v676_v16, 0.0 }
 0x198   :  { %v600_v63 = vpop.f32.mrf.mxu1 }
 0x199   :  { %v473_v35 = vpack.c.bf16 %v424_v9, %v423_v23  ;;  %vm836_vm6 = vcmp.ge.f32.partialorder %v772_v62, 0.0  ;;  %v601_v27 = vadd.f32 %v1416_v60, %v600_v63  ;;  %v1115_v23 = vld [vmem:[#allocation2 + $0x170] sm:$0xff]  ;;  %v1116_v62 = vld [vmem:[#allocation2 + $0x80] sm:$0xff] }
 0x19a   :  { %v900_v1 = vsel %vm836_vm6, %v1357_v41, 0.0  ;;  %v387_v2 = vpop.f32.mrf.mxu2 }
 0x19b   :  { %964 = vst [vmem:[#allocation8 + $0x150] sm:$0xff] %v900_v1  ;;  %v742_v20 = vmax.f32 %v601_v27, 0.0  ;;  %v388_v3 = vadd.f32 %v1380_v7, %v387_v2  ;;  %639 = vmatmul.bf16.gmra.mxu1 %v473_v35  ;;  %v1117_v27 = vld [vmem:[#allocation2 + $0x178] sm:$0xff] }
 0x19c   :  { %v310_v4 = vpop.f32.mrf.mxu0  ;;  %v677_v40 = vpop.f32.mrf.mxu3 }
 0x19d   :  { %vm806_vm7 = vcmp.ge.f32.partialorder %v742_v20, 0.0  ;;  %v456_v5 = vmax.f32 %v388_v3, 0.0  ;;  %v678_v28 = vadd.f32 %v1416_v60, %v677_v40  ;;  %v311_v41 = vadd.f32 %v1380_v7, %v310_v4  ;;  %v1118_v4 = vld [vmem:[#allocation2 + $0x88] sm:$0xff] }
 0x19e   :  { %v870_v6 = vsel %vm806_vm7, %v1365_v48, 0.0 }
 0x19f   :  { %934 = vst [vmem:[#allocation8 + $0x60] sm:$0xff] %v870_v6  ;;  %v489_v12 = vpack.c.bf16 %v456_v5, %v455_v10  ;;  %v773_v17 = vmax.f32 %v678_v28, 0.0  ;;  %v425_v21 = vmax.f32 %v311_v41, 0.0  ;;  %v1119_v6 = vld [vmem:[#allocation2 + $0x180] sm:$0xff] }
 0x1a0   :  { %v602_v13 = vpop.f32.mrf.mxu1 }
 0x1a1   :  { %vm837_vm8 = vcmp.ge.f32.partialorder %v773_v17, 0.0  ;;  %v603_v18 = vadd.f32 %v1416_v60, %v602_v13  ;;  %719 = vmatmul.bf16.gmra.mxu3 %v489_v12 }
 0x1a2   :  { %v901_v19 = vsel %vm837_vm8, %v1359_v42, 0.0  ;;  %v390_v24 = vpop.f32.mrf.mxu2 }
 0x1a3   :  { %965 = vst [vmem:[#allocation8 + $0x158] sm:$0xff] %v901_v19  ;;  %v743_v32 = vmax.f32 %v603_v18, 0.0  ;;  %v391_v38 = vadd.f32 %v1380_v7, %v390_v24  ;;  %v1120_v18 = vld [vmem:[#allocation2 + $0x90] sm:$0xff] }
 0x1a4   :  { %v312_v14 = vpop.f32.mrf.mxu0  ;;  %v680_v25 = vpop.f32.mrf.mxu3 }
 0x1a5   :  { %vm807_vm9 = vcmp.ge.f32.partialorder %v743_v32, 0.0  ;;  %v313_v48 = vadd.f32 %v1380_v7, %v312_v14  ;;  %v681_v30 = vadd.f32 %v1416_v60, %v680_v25  ;;  %v1121_v25 = vld [vmem:[#allocation2 + $0x188] sm:$0xff] }
 0x1a6   :  { %v871_v31 = vsel %vm807_vm9, %v1367_v49, 0.0  ;;  %v457_v49 = vmax.f32 %v391_v38, 0.0 }
 0x1a7   :  { %935 = vst [vmem:[#allocation8 + $0x68] sm:$0xff] %v871_v31  ;;  %v426_v36 = vmax.f32 %v313_v48, 0.0  ;;  %v774_v29 = vmax.f32 %v681_v30, 0.0 }
 0x1a8   :  { %v605_v37 = vpop.f32.mrf.mxu1 }
 0x1a9   :  { %v474_v42 = vpack.c.bf16 %v426_v36, %v425_v21  ;;  %vm838_vm10 = vcmp.ge.f32.partialorder %v774_v29, 0.0  ;;  %v606_v11 = vadd.f32 %v1416_v60, %v605_v37  ;;  %v1122_v36 = vld [vmem:[#allocation2 + $0x98] sm:$0xff] }
 0x1aa   :  { %v902_v43 = vsel %vm838_vm10, %v1369_v50, 0.0  ;;  %v392_v22 = vpop.f32.mrf.mxu2 }
 0x1ab   :  { %966 = vst [vmem:[#allocation8 + $0x160] sm:$0xff] %v902_v43  ;;  %v744_v44 = vmax.f32 %v606_v11, 0.0  ;;  %v393_v33 = vadd.f32 %v1380_v7, %v392_v22  ;;  %644 = vmatmul.bf16.gmra.mxu1 %v474_v42  ;;  %v1123_v11 = vld [vmem:[#allocation2 + $0x190] sm:$0xff] }
 0x1ac   :  { %v682_v8 = vpop.f32.mrf.mxu3 }
 0x1ad   :  { %vm808_vm11 = vcmp.ge.f32.partialorder %v744_v44, 0.0  ;;  %v458_v45 = vmax.f32 %v393_v33, 0.0  ;;  %v683_v46 = vadd.f32 %v1416_v60, %v682_v8  ;;  %v1124_v8 = vld [vmem:[#allocation2 + $0xa0] sm:$0xff] }
 0x1ae   :  { %v872_v47 = vsel %vm808_vm11, %v1374_v58, 0.0 }
 0x1af   :  { %936 = vst [vmem:[#allocation8 + $0x70] sm:$0xff] %v872_v47  ;;  %v490_v15 = vpack.c.bf16 %v458_v45, %v457_v49  ;;  %v775_v51 = vmax.f32 %v683_v46, 0.0 }
 0x1b0   :  { %v607_v26 = vpop.f32.mrf.mxu1 }
 0x1b1   :  { %vm839_vm12 = vcmp.ge.f32.partialorder %v775_v51, 0.0  ;;  %v608_v50 = vadd.f32 %v1416_v60, %v607_v26  ;;  %724 = vmatmul.bf16.gmra.mxu3 %v490_v15  ;;  %v1125_v15 = vld [vmem:[#allocation2 + $0x198] sm:$0xff] }
 0x1b2   :  { %v903_v52 = vsel %vm839_vm12, %v1114_v34, 0.0 }
 0x1b3   :  { %967 = vst [vmem:[#allocation8 + $0x168] sm:$0xff] %v903_v52  ;;  %v745_v7 = vmax.f32 %v608_v50, 0.0  ;;  %v1126_v52 = vld [vmem:[#allocation2 + $0xa8] sm:$0xff] }
 0x1b4   :  { %v685_v53 = vpop.f32.mrf.mxu3 }
 0x1b5   :  { %vm809_vm13 = vcmp.ge.f32.partialorder %v745_v7, 0.0  ;;  %v686_v54 = vadd.f32 %v1416_v60, %v685_v53 }
 0x1b6   :  { %v873_v55 = vsel %vm809_vm13, %v1376_v59, 0.0 }
 0x1b7   :  { %937 = vst [vmem:[#allocation8 + $0x78] sm:$0xff] %v873_v55  ;;  %v776_v58 = vmax.f32 %v686_v54, 0.0 }
 0x1b8   :  { %v610_v56 = vpop.f32.mrf.mxu1 }
 0x1b9   :  { %vm840_vm14 = vcmp.ge.f32.partialorder %v776_v58, 0.0  ;;  %v611_v57 = vadd.f32 %v1416_v60, %v610_v56  ;;  %v1127_v58 = vld [vmem:[#allocation2 + $0x1a0] sm:$0xff] }
 0x1ba   :  { %v904_v39 = vsel %vm840_vm14, %v1115_v23, 0.0 }
 0x1bb   :  { %968 = vst [vmem:[#allocation8 + $0x170] sm:$0xff] %v904_v39  ;;  %v746_v16 = vmax.f32 %v611_v57, 0.0 }
 0x1bc   :  { %v687_v61 = vpop.f32.mrf.mxu3 }
 0x1bd   :  { %vm810_vm15 = vcmp.ge.f32.partialorder %v746_v16, 0.0  ;;  %v688_v9 = vadd.f32 %v1416_v60, %v687_v61  ;;  %v1128_v16 = vld [vmem:[#allocation2 + $0xb0] sm:$0xff] }
 0x1be   :  { %v874_v63 = vsel %vm810_vm15, %v1116_v62, 0.0 }
 0x1bf   :  { %938 = vst [vmem:[#allocation8 + $0x80] sm:$0xff] %v874_v63  ;;  %v777_v0 = vmax.f32 %v688_v9, 0.0 }
 0x1c0   :  { %v612_v35 = vpop.f32.mrf.mxu1 }
 0x1c1   :  { %vm841_vm0 = vcmp.ge.f32.partialorder %v777_v0, 0.0  ;;  %v613_v59 = vadd.f32 %v1416_v60, %v612_v35  ;;  %v1129_v0 = vld [vmem:[#allocation2 + $0x1a8] sm:$0xff] }
 0x1c2   :  { %v905_v1 = vsel %vm841_vm0, %v1117_v27, 0.0 }
 0x1c3   :  { %969 = vst [vmem:[#allocation8 + $0x178] sm:$0xff] %v905_v1  ;;  %v747_v2 = vmax.f32 %v613_v59, 0.0 }
 0x1c4   :  { %v690_v20 = vpop.f32.mrf.mxu3 }
 0x1c5   :  { %vm811_vm1 = vcmp.ge.f32.partialorder %v747_v2, 0.0  ;;  %v691_v3 = vadd.f32 %v1416_v60, %v690_v20  ;;  %v1130_v2 = vld [vmem:[#allocation2 + $0xb8] sm:$0xff] }
 0x1c6   :  { %v875_v40 = vsel %vm811_vm1, %v1118_v4, 0.0 }
 0x1c7   :  { %939 = vst [vmem:[#allocation8 + $0x88] sm:$0xff] %v875_v40  ;;  %v778_v10 = vmax.f32 %v691_v3, 0.0 }
 0x1c8   :  { %v615_v5 = vpop.f32.mrf.mxu1 }
 0x1c9   :  { %vm842_vm2 = vcmp.ge.f32.partialorder %v778_v10, 0.0  ;;  %v616_v28 = vadd.f32 %v1416_v60, %v615_v5  ;;  %v1131_v10 = vld [vmem:[#allocation2 + $0x1b0] sm:$0xff] }
 0x1ca   :  { %v906_v12 = vsel %vm842_vm2, %v1119_v6, 0.0 }
 0x1cb   :  { %970 = vst [vmem:[#allocation8 + $0x180] sm:$0xff] %v906_v12  ;;  %v748_v17 = vmax.f32 %v616_v28, 0.0 }
 0x1cc   :  { %v692_v13 = vpop.f32.mrf.mxu3 }
 0x1cd   :  { %vm812_vm3 = vcmp.ge.f32.partialorder %v748_v17, 0.0  ;;  %v693_v41 = vadd.f32 %v1416_v60, %v692_v13  ;;  %v1132_v17 = vld [vmem:[#allocation2 + $0xc0] sm:$0xff] }
 0x1ce   :  { %v876_v19 = vsel %vm812_vm3, %v1120_v18, 0.0 }
 0x1cf   :  { %940 = vst [vmem:[#allocation8 + $0x90] sm:$0xff] %v876_v19  ;;  %v779_v24 = vmax.f32 %v693_v41, 0.0 }
 0x1d0   :  { %v617_v32 = vpop.f32.mrf.mxu1 }
 0x1d1   :  { %vm843_vm4 = vcmp.ge.f32.partialorder %v779_v24, 0.0  ;;  %v618_v14 = vadd.f32 %v1416_v60, %v617_v32  ;;  %v1133_v24 = vld [vmem:[#allocation2 + $0x1b8] sm:$0xff] }
 0x1d2   :  { %v907_v21 = vsel %vm843_vm4, %v1121_v25, 0.0 }
 0x1d3   :  { %971 = vst [vmem:[#allocation8 + $0x188] sm:$0xff] %v907_v21  ;;  %v749_v48 = vmax.f32 %v618_v14, 0.0 }
 0x1d4   :  { %v695_v30 = vpop.f32.mrf.mxu3 }
 0x1d5   :  { %vm813_vm5 = vcmp.ge.f32.partialorder %v749_v48, 0.0  ;;  %v696_v31 = vadd.f32 %v1416_v60, %v695_v30  ;;  %v1134_v48 = vld [vmem:[#allocation2 + $0xc8] sm:$0xff] }
 0x1d6   :  { %v877_v29 = vsel %vm813_vm5, %v1122_v36, 0.0 }
 0x1d7   :  { %941 = vst [vmem:[#allocation8 + $0x98] sm:$0xff] %v877_v29  ;;  %v780_v37 = vmax.f32 %v696_v31, 0.0 }
 0x1d8   :  { %v620_v38 = vpop.f32.mrf.mxu1 }
 0x1d9   :  { %vm844_vm6 = vcmp.ge.f32.partialorder %v780_v37, 0.0  ;;  %v621_v42 = vadd.f32 %v1416_v60, %v620_v38  ;;  %v1135_v37 = vld [vmem:[#allocation2 + $0x1c0] sm:$0xff] }
 0x1da   :  { %v908_v43 = vsel %vm844_vm6, %v1123_v11, 0.0 }
 0x1db   :  { %972 = vst [vmem:[#allocation8 + $0x190] sm:$0xff] %v908_v43  ;;  %v750_v22 = vmax.f32 %v621_v42, 0.0 }
 0x1dc   :  { %v697_v44 = vpop.f32.mrf.mxu3 }
 0x1dd   :  { %vm814_vm7 = vcmp.ge.f32.partialorder %v750_v22, 0.0  ;;  %v698_v33 = vadd.f32 %v1416_v60, %v697_v44  ;;  %v1136_v22 = vld [vmem:[#allocation2 + $0xd0] sm:$0xff] }
 0x1de   :  { %v878_v49 = vsel %vm814_vm7, %v1124_v8, 0.0 }
 0x1df   :  { %942 = vst [vmem:[#allocation8 + $0xa0] sm:$0xff] %v878_v49  ;;  %v781_v45 = vmax.f32 %v698_v33, 0.0 }
 0x1e0   :  { %v622_v46 = vpop.f32.mrf.mxu1 }
 0x1e1   :  { %vm845_vm8 = vcmp.ge.f32.partialorder %v781_v45, 0.0  ;;  %v623_v47 = vadd.f32 %v1416_v60, %v622_v46  ;;  %v1137_v45 = vld [vmem:[#allocation2 + $0x1c8] sm:$0xff] }
 0x1e2   :  { %v909_v51 = vsel %vm845_vm8, %v1125_v15, 0.0 }
 0x1e3   :  { %973 = vst [vmem:[#allocation8 + $0x198] sm:$0xff] %v909_v51  ;;  %v751_v26 = vmax.f32 %v623_v47, 0.0 }
 0x1e4   :  { %v700_v50 = vpop.f32.mrf.mxu3 }
 0x1e5   :  { %vm815_vm9 = vcmp.ge.f32.partialorder %v751_v26, 0.0  ;;  %v701_v34 = vadd.f32 %v1416_v60, %v700_v50  ;;  %v1138_v26 = vld [vmem:[#allocation2 + $0xd8] sm:$0xff] }
 0x1e6   :  { %v879_v7 = vsel %vm815_vm9, %v1126_v52, 0.0 }
 0x1e7   :  { %943 = vst [vmem:[#allocation8 + $0xa8] sm:$0xff] %v879_v7  ;;  %v782_v53 = vmax.f32 %v701_v34, 0.0 }
 0x1e8   :  { %v625_v54 = vpop.f32.mrf.mxu1 }
 0x1e9   :  { %vm846_vm10 = vcmp.ge.f32.partialorder %v782_v53, 0.0  ;;  %v626_v55 = vadd.f32 %v1416_v60, %v625_v54  ;;  %v1139_v53 = vld [vmem:[#allocation2 + $0x1d0] sm:$0xff] }
 0x1ea   :  { %v910_v56 = vsel %vm846_vm10, %v1127_v58, 0.0 }
 0x1eb   :  { %974 = vst [vmem:[#allocation8 + $0x1a0] sm:$0xff] %v910_v56  ;;  %v752_v57 = vmax.f32 %v626_v55, 0.0 }
 0x1ec   :  { %v702_v23 = vpop.f32.mrf.mxu3 }
 0x1ed   :  { %vm816_vm11 = vcmp.ge.f32.partialorder %v752_v57, 0.0  ;;  %v703_v39 = vadd.f32 %v1416_v60, %v702_v23  ;;  %v1140_v57 = vld [vmem:[#allocation2 + $0xe0] sm:$0xff] }
 0x1ee   :  { %v880_v61 = vsel %vm816_vm11, %v1128_v16, 0.0 }
 0x1ef   :  { %944 = vst [vmem:[#allocation8 + $0xb0] sm:$0xff] %v880_v61  ;;  %v783_v9 = vmax.f32 %v703_v39, 0.0 }
 0x1f0   :  { %v627_v62 = vpop.f32.mrf.mxu1 }
 0x1f1   :  { %vm847_vm12 = vcmp.ge.f32.partialorder %v783_v9, 0.0  ;;  %v628_v63 = vadd.f32 %v1416_v60, %v627_v62  ;;  %v1141_v9 = vld [vmem:[#allocation2 + $0x1d8] sm:$0xff] }
 0x1f2   :  { %v911_v35 = vsel %vm847_vm12, %v1129_v0, 0.0 }
 0x1f3   :  { %975 = vst [vmem:[#allocation8 + $0x1a8] sm:$0xff] %v911_v35  ;;  %v753_v59 = vmax.f32 %v628_v63, 0.0 }
 0x1f4   :  { %v705_v27 = vpop.f32.mrf.mxu3 }
 0x1f5   :  { %vm817_vm13 = vcmp.ge.f32.partialorder %v753_v59, 0.0  ;;  %v706_v1 = vadd.f32 %v1416_v60, %v705_v27  ;;  %v1142_v59 = vld [vmem:[#allocation2 + $0xe8] sm:$0xff] }
 0x1f6   :  { %v881_v20 = vsel %vm817_vm13, %v1130_v2, 0.0 }
 0x1f7   :  { %945 = vst [vmem:[#allocation8 + $0xb8] sm:$0xff] %v881_v20  ;;  %v784_v3 = vmax.f32 %v706_v1, 0.0 }
 0x1f8   :  { %v630_v4 = vpop.f32.mrf.mxu1 }
 0x1f9   :  { %vm848_vm14 = vcmp.ge.f32.partialorder %v784_v3, 0.0  ;;  %v631_v40 = vadd.f32 %v1416_v60, %v630_v4  ;;  %v1143_v3 = vld [vmem:[#allocation2 + $0x1e0] sm:$0xff] }
 0x1fa   :  { %v912_v5 = vsel %vm848_vm14, %v1131_v10, 0.0 }
 0x1fb   :  { %976 = vst [vmem:[#allocation8 + $0x1b0] sm:$0xff] %v912_v5  ;;  %v754_v28 = vmax.f32 %v631_v40, 0.0 }
 0x1fc   :  { %v707_v6 = vpop.f32.mrf.mxu3 }
 0x1fd   :  { %vm818_vm15 = vcmp.ge.f32.partialorder %v754_v28, 0.0  ;;  %v708_v12 = vadd.f32 %v1416_v60, %v707_v6  ;;  %v1144_v28 = vld [vmem:[#allocation2 + $0xf0] sm:$0xff] }
 0x1fe   :  { %v882_v13 = vsel %vm818_vm15, %v1132_v17, 0.0 }
 0x1ff   :  { %946 = vst [vmem:[#allocation8 + $0xc0] sm:$0xff] %v882_v13  ;;  %v785_v41 = vmax.f32 %v708_v12, 0.0 }
 0x200   :  { %v632_v18 = vpop.f32.mrf.mxu1 }
 0x201   :  { %vm849_vm0 = vcmp.ge.f32.partialorder %v785_v41, 0.0  ;;  %v633_v19 = vadd.f32 %v1416_v60, %v632_v18  ;;  %v1145_v41 = vld [vmem:[#allocation2 + $0x1e8] sm:$0xff] }
 0x202   :  { %v913_v32 = vsel %vm849_vm0, %v1133_v24, 0.0 }
 0x203   :  { %977 = vst [vmem:[#allocation8 + $0x1b8] sm:$0xff] %v913_v32  ;;  %v755_v14 = vmax.f32 %v633_v19, 0.0 }
 0x204   :  { %v710_v25 = vpop.f32.mrf.mxu3 }
 0x205   :  { %vm819_vm1 = vcmp.ge.f32.partialorder %v755_v14, 0.0  ;;  %v711_v21 = vadd.f32 %v1416_v60, %v710_v25  ;;  %v1146_v14 = vld [vmem:[#allocation2 + $0xf8] sm:$0xff] }
 0x206   :  { %v883_v30 = vsel %vm819_vm1, %v1134_v48, 0.0  ;;  %v1147_v48 = vld [vmem:[#allocation2 + $0x1f0] sm:$0xff] }
 0x207   :  { %947 = vst [vmem:[#allocation8 + $0xc8] sm:$0xff] %v883_v30  ;;  %v786_v31 = vmax.f32 %v711_v21, 0.0 }
 0x208   :  { %v635_v36 = vpop.f32.mrf.mxu1 }
 0x209   :  { %vm850_vm2 = vcmp.ge.f32.partialorder %v786_v31, 0.0  ;;  %v636_v29 = vadd.f32 %v1416_v60, %v635_v36 }
 0x20a   :  { %v914_v38 = vsel %vm850_vm2, %v1135_v37, 0.0  ;;  %v1148_v37 = vld [vmem:[#allocation2 + $0x1f8] sm:$0xff] }
 0x20b   :  { %978 = vst [vmem:[#allocation8 + $0x1c0] sm:$0xff] %v914_v38  ;;  %v756_v42 = vmax.f32 %v636_v29, 0.0 }
 0x20c   :  { %v712_v11 = vpop.f32.mrf.mxu3 }
 0x20d   :  { %vm820_vm3 = vcmp.ge.f32.partialorder %v756_v42, 0.0  ;;  %v713_v43 = vadd.f32 %v1416_v60, %v712_v11 }
 0x20e   :  { %v884_v44 = vsel %vm820_vm3, %v1136_v22, 0.0 }
 0x20f   :  { %948 = vst [vmem:[#allocation8 + $0xd0] sm:$0xff] %v884_v44  ;;  %v787_v33 = vmax.f32 %v713_v43, 0.0 }
 0x210   :  { %v637_v8 = vpop.f32.mrf.mxu1 }
 0x211   :  { %vm851_vm4 = vcmp.ge.f32.partialorder %v787_v33, 0.0  ;;  %v638_v49 = vadd.f32 %v1416_v60, %v637_v8 }
 0x212   :  { %v915_v46 = vsel %vm851_vm4, %v1137_v45, 0.0 }
 0x213   :  { %979 = vst [vmem:[#allocation8 + $0x1c8] sm:$0xff] %v915_v46  ;;  %v757_v47 = vmax.f32 %v638_v49, 0.0 }
 0x214   :  { %v715_v15 = vpop.f32.mrf.mxu3 }
 0x215   :  { %vm821_vm5 = vcmp.ge.f32.partialorder %v757_v47, 0.0  ;;  %v716_v51 = vadd.f32 %v1416_v60, %v715_v15 }
 0x216   :  { %v885_v50 = vsel %vm821_vm5, %v1138_v26, 0.0 }
 0x217   :  { %949 = vst [vmem:[#allocation8 + $0xd8] sm:$0xff] %v885_v50  ;;  %v788_v34 = vmax.f32 %v716_v51, 0.0 }
 0x218   :  { %v640_v52 = vpop.f32.mrf.mxu1 }
 0x219   :  { %vm852_vm6 = vcmp.ge.f32.partialorder %v788_v34, 0.0  ;;  %v641_v7 = vadd.f32 %v1416_v60, %v640_v52 }
 0x21a   :  { %v916_v54 = vsel %vm852_vm6, %v1139_v53, 0.0 }
 0x21b   :  { %980 = vst [vmem:[#allocation8 + $0x1d0] sm:$0xff] %v916_v54  ;;  %v758_v55 = vmax.f32 %v641_v7, 0.0 }
 0x21c   :  { %v717_v58 = vpop.f32.mrf.mxu3 }
 0x21d   :  { %vm822_vm7 = vcmp.ge.f32.partialorder %v758_v55, 0.0  ;;  %v718_v56 = vadd.f32 %v1416_v60, %v717_v58 }
 0x21e   :  { %v886_v23 = vsel %vm822_vm7, %v1140_v57, 0.0 }
 0x21f   :  { %950 = vst [vmem:[#allocation8 + $0xe0] sm:$0xff] %v886_v23  ;;  %v789_v39 = vmax.f32 %v718_v56, 0.0 }
 0x220   :  { %v642_v16 = vpop.f32.mrf.mxu1 }
 0x221   :  { %vm853_vm8 = vcmp.ge.f32.partialorder %v789_v39, 0.0  ;;  %v643_v61 = vadd.f32 %v1416_v60, %v642_v16 }
 0x222   :  { %v917_v62 = vsel %vm853_vm8, %v1141_v9, 0.0 }
 0x223   :  { %981 = vst [vmem:[#allocation8 + $0x1d8] sm:$0xff] %v917_v62  ;;  %v759_v63 = vmax.f32 %v643_v61, 0.0 }
 0x224   :  { %v720_v0 = vpop.f32.mrf.mxu3 }
 0x225   :  { %vm823_vm9 = vcmp.ge.f32.partialorder %v759_v63, 0.0  ;;  %v721_v35 = vadd.f32 %v1416_v60, %v720_v0 }
 0x226   :  { %v887_v27 = vsel %vm823_vm9, %v1142_v59, 0.0 }
 0x227   :  { %951 = vst [vmem:[#allocation8 + $0xe8] sm:$0xff] %v887_v27  ;;  %v790_v1 = vmax.f32 %v721_v35, 0.0 }
 0x228   :  { %v645_v2 = vpop.f32.mrf.mxu1 }
 0x229   :  { %vm854_vm10 = vcmp.ge.f32.partialorder %v790_v1, 0.0  ;;  %v646_v20 = vadd.f32 %v1416_v60, %v645_v2 }
 0x22a   :  { %v918_v4 = vsel %vm854_vm10, %v1143_v3, 0.0 }
 0x22b   :  { %982 = vst [vmem:[#allocation8 + $0x1e0] sm:$0xff] %v918_v4  ;;  %v760_v40 = vmax.f32 %v646_v20, 0.0 }
 0x22c   :  { %v722_v10 = vpop.f32.mrf.mxu3 }
 0x22d   :  { %vm824_vm11 = vcmp.ge.f32.partialorder %v760_v40, 0.0  ;;  %v723_v5 = vadd.f32 %v1416_v60, %v722_v10 }
 0x22e   :  { %v888_v6 = vsel %vm824_vm11, %v1144_v28, 0.0 }
 0x22f   :  { %952 = vst [vmem:[#allocation8 + $0xf0] sm:$0xff] %v888_v6  ;;  %v791_v12 = vmax.f32 %v723_v5, 0.0 }
 0x230   :  { %v647_v17 = vpop.f32.mrf.mxu1 }
 0x231   :  { %vm855_vm12 = vcmp.ge.f32.partialorder %v791_v12, 0.0  ;;  %v648_v13 = vadd.f32 %v1416_v60, %v647_v17 }
 0x232   :  { %v919_v18 = vsel %vm855_vm12, %v1145_v41, 0.0 }
 0x233   :  { %983 = vst [vmem:[#allocation8 + $0x1e8] sm:$0xff] %v919_v18  ;;  %v761_v19 = vmax.f32 %v648_v13, 0.0 }
 0x234   :  { %v725_v24 = vpop.f32.mrf.mxu3 }
 0x235   :  { %vm825_vm13 = vcmp.ge.f32.partialorder %v761_v19, 0.0  ;;  %v726_v32 = vadd.f32 %v1416_v60, %v725_v24 }
 0x236   :  { %v889_v25 = vsel %vm825_vm13, %v1146_v14, 0.0 }
 0x237   :  { %953 = vst [vmem:[#allocation8 + $0xf8] sm:$0xff] %v889_v25  ;;  %v792_v21 = vmax.f32 %v726_v32, 0.0 }
 0x239   :  { %vm856_vm14 = vcmp.ge.f32.partialorder %v792_v21, 0.0 }
 0x23a   :  { %v920_v30 = vsel %vm856_vm14, %v1147_v48, 0.0 }
 0x23b   :  { %984 = vst [vmem:[#allocation8 + $0x1f0] sm:$0xff] %v920_v30 }
 0x23c   :  { %v727_v31 = vpop.f32.mrf.mxu3 }
 0x23d   :  { %v728_v36 = vadd.f32 %v1416_v60, %v727_v31 }
 0x23f   :  { %v793_v29 = vmax.f32 %v728_v36, 0.0 }
 0x241   :  { %vm857_vm15 = vcmp.ge.f32.partialorder %v793_v29, 0.0 }
 0x242   :  { %v921_v38 = vsel %vm857_vm15, %v1148_v37, 0.0 }
 0x243   :  { %985 = vst [vmem:[#allocation8 + $0x1f8] sm:$0xff] %v921_v38 }
 0x244   :  { %998 = dma.vmem_to_hbm [thread:$0]  %s991_s4, 8192, %s993_s7, [#allocation4], %s1255_s24, %s1255_s24, %s1256_s25  }
 0x245   :  { %1249 = dma.done.wait [#allocation4], 8192  }
 0x246   :  { %1250 = vsyncadd [#allocation4], 4294959104 }
 0x247   :  { %1003 = vsyncpa [#allocation3], 1 }
 0x248   :  { %1004 = vsyncpa [#allocation6], 1 }
 0x249   :  { %1005 = vsyncpa [#allocation4], 1 }

// kernel: tpu_custom_call.1
= control target key start
LH: loop header
LB: loop body
LE: loop exit
PB: predicated region body
PF: predicated region fallthrough
CT: control target
= control target key end

     0   :  { %8 = vsyncpa [#allocation3], 0  ;;  %s1547_s0 = inlined_call_operand.hbm [shape: f32[512,128], index: 0, kind: input, shape index: {}]   ;;  %s1548_s1 = inlined_call_operand.hbm [shape: bf16[2,128,128], index: 1, kind: input, shape index: {}]   ;;  %s1549_s2 = inlined_call_operand.hbm [shape: f32[2,1,128], index: 2, kind: input, shape index: {}]   ;;  %s1550_s3 = inlined_call_operand.hbm [shape: f32[512,128], index: 3, kind: output, shape index: {}]  }
   0x1   :  { %9 = vsyncpa [#allocation6], 0  ;;  %s28_s14 = sshll.u32 %s1548_s1, 4  ;;  %s29_s14 = int_to_ptr.hbm [resolvable:$true] %s28_s14 }
   0x2   :  { %10 = vsyncpa [#allocation4], 0  ;;  %s1251_s15 = smov [#allocation5]   ;;  %s15_s19 = sshll.u32 %s1547_s0, 4  ;;  %s16_s19 = int_to_ptr.hbm [resolvable:$true] %s15_s19 }
   0x3   :  { %s30_s16 = sshll.u32 %s1251_s15, 4  ;;  %s1252_s20 = smov 64   ;;  %s31_s16 = int_to_ptr.vmem [resolvable:$true] %s30_s16 }
   0x4   :  { %s1253_s21 = smov 4   ;;  %s1254_s22 = smov [#allocation2]  }
   0x5   :  { %36 = dma.hbm_to_vmem [thread:$0]  %s29_s14, 2048, %s31_s16, [#allocation6], %s1252_s20, %s1252_s20, %s1253_s21  }
   0x6   :  { %s17_s23 = sshll.u32 %s1254_s22, 4  ;;  %s1255_s24 = smov 128   ;;  %s18_s23 = int_to_ptr.vmem [resolvable:$true] %s17_s23 }
   0x7   :  { %s1256_s25 = smov 8   ;;  %s41_s27 = sshll.u32 %s1549_s2, 4  ;;  %s42_s27 = int_to_ptr.hbm [resolvable:$true] %s41_s27 }
   0x8   :  { %23 = dma.hbm_to_vmem [thread:$0]  %s16_s19, 8192, %s18_s23, [#allocation3], %s1255_s24, %s1255_s24, %s1256_s25  }
   0x9   :  { %s1257_s28 = smov [#allocation7]   ;;  %s1258_s29 = smov 16  }
   0xa   :  { %s43_s0 = sshll.u32 %s1257_s28, 4  ;;  %s1259_s30 = smov 1   ;;  %s44_s0 = int_to_ptr.vmem [resolvable:$true] %s43_s0 }
   0xb   :  { %49 = dma.hbm_to_vmem [thread:$0]  %s42_s27, 32, %s44_s0, [#allocation6], %s1258_s29, %s1258_s29, %s1259_s30  }
   0xc   :  { %1245 = dma.done.wait [#allocation3], 8192  }
   0xd   :  { %1246 = vsyncadd [#allocation3], 4294959104 }
   0xe   :  { %1247 = dma.done.wait [#allocation6], 2080  }
   0xf   :  { %1248 = vsyncadd [#allocation6], 4294965216  ;;  %v1077_v0 = vld [vmem:[#allocation5 + $0x38] sm:$0xff]  ;;  %v1076_v1 = vld [vmem:[#allocation5 + $0x30] sm:$0xff]  ;;  %s1260_s2 = smov [#allocation8]   ;;  %s992_s7 = sshll.u32 %s1550_s3, 4  ;;  %s993_s7 = int_to_ptr.hbm [resolvable:$true] %s992_s7 }
  0x10   :  { %226 = vmatpush.bf16.msra.mxu0 %v1077_v0  ;;  %1086 = vmatpush.bf16.msra.mxu2 %v1077_v0  ;;  %v1075_v2 = vld [vmem:[#allocation5 + $0x28] sm:$0xff]  ;;  %v1074_v3 = vld [vmem:[#allocation5 + $0x20] sm:$0xff]  ;;  %v1073_v4 = vld [vmem:[#allocation5 + $0x18] sm:$0xff]  ;;  %s990_s4 = sshll.u32 %s1260_s2, 4  ;;  %s991_s4 = int_to_ptr.vmem [resolvable:$true] %s990_s4 }
  0x11   :  { %v1072_v5 = vld [vmem:[#allocation5 + $0x10] sm:$0xff]  ;;  %v1071_v6 = vld [vmem:[#allocation5 + $0x8] sm:$0xff]  ;;  %v1070_v7 = vld [vmem:[#allocation5] sm:$0xff] }
  0x12   :  { %v1293_v8 = vld [vmem:[#allocation2] sm:$0xff]  ;;  %v1295_v9 = vld [vmem:[#allocation2 + $0x8] sm:$0xff]  ;;  %v1305_v14 = vld [vmem:[#allocation2 + $0x10] sm:$0xff] }
  0x13   :  { %v1297_v10 = vld [vmem:[#allocation2 + $0x100] sm:$0xff]  ;;  %v1299_v11 = vld [vmem:[#allocation2 + $0x108] sm:$0xff]  ;;  %v126_v12 = vpack.c.bf16 %v1295_v9, %v1293_v8  ;;  %v1307_v15 = vld [vmem:[#allocation2 + $0x18] sm:$0xff] }
  0x14   :  { %227 = vmatpush.bf16.msra.mxu0 %v1076_v1  ;;  %1087 = vmatpush.bf16.msra.mxu2 %v1076_v1  ;;  %v142_v13 = vpack.c.bf16 %v1299_v11, %v1297_v10  ;;  %v1309_v16 = vld [vmem:[#allocation2 + $0x110] sm:$0xff]  ;;  %v1311_v17 = vld [vmem:[#allocation2 + $0x118] sm:$0xff]  ;;  %v127_v18 = vpack.c.bf16 %v1307_v15, %v1305_v14  ;;  %v1317_v20 = vld [vmem:[#allocation2 + $0x20] sm:$0xff] }
  0x15   :  { %v143_v19 = vpack.c.bf16 %v1311_v17, %v1309_v16  ;;  %v1319_v21 = vld [vmem:[#allocation2 + $0x28] sm:$0xff]  ;;  %v1321_v22 = vld [vmem:[#allocation2 + $0x120] sm:$0xff]  ;;  %v1329_v26 = vld [vmem:[#allocation2 + $0x30] sm:$0xff] }
  0x16   :  { %v1323_v23 = vld [vmem:[#allocation2 + $0x128] sm:$0xff]  ;;  %v128_v24 = vpack.c.bf16 %v1319_v21, %v1317_v20  ;;  %v1331_v27 = vld [vmem:[#allocation2 + $0x38] sm:$0xff]  ;;  %v1333_v28 = vld [vmem:[#allocation2 + $0x130] sm:$0xff] }
  0x17   :  { %v144_v25 = vpack.c.bf16 %v1323_v23, %v1321_v22  ;;  %v1335_v29 = vld [vmem:[#allocation2 + $0x138] sm:$0xff]  ;;  %v129_v30 = vpack.c.bf16 %v1331_v27, %v1329_v26  ;;  %v1341_v32 = vld [vmem:[#allocation2 + $0x40] sm:$0xff]  ;;  %v1343_v33 = vld [vmem:[#allocation2 + $0x48] sm:$0xff] }
  0x18   :  { %228 = vmatpush.bf16.msra.mxu0 %v1075_v2  ;;  %1088 = vmatpush.bf16.msra.mxu2 %v1075_v2  ;;  %v145_v31 = vpack.c.bf16 %v1335_v29, %v1333_v28  ;;  %v1345_v34 = vld [vmem:[#allocation2 + $0x140] sm:$0xff]  ;;  %v1347_v35 = vld [vmem:[#allocation2 + $0x148] sm:$0xff]  ;;  %v130_v36 = vpack.c.bf16 %v1343_v33, %v1341_v32  ;;  %v1085_v38 = vld [vmem:[#allocation5 + $0x78] sm:$0xff] }
  0x19   :  { %v146_v37 = vpack.c.bf16 %v1347_v35, %v1345_v34  ;;  %561 = vmatpush.bf16.msra.mxu1 %v1085_v38  ;;  %1094 = vmatpush.bf16.msra.mxu3 %v1085_v38  ;;  %v1353_v39 = vld [vmem:[#allocation2 + $0x50] sm:$0xff]  ;;  %v1355_v40 = vld [vmem:[#allocation2 + $0x58] sm:$0xff]  ;;  %v1083_v46 = vld [vmem:[#allocation5 + $0x68] sm:$0xff] }
  0x1a   :  { %v1357_v41 = vld [vmem:[#allocation2 + $0x150] sm:$0xff]  ;;  %v1359_v42 = vld [vmem:[#allocation2 + $0x158] sm:$0xff]  ;;  %v131_v43 = vpack.c.bf16 %v1355_v40, %v1353_v39  ;;  %v1082_v47 = vld [vmem:[#allocation5 + $0x60] sm:$0xff] }
  0x1b   :  { %v147_v44 = vpack.c.bf16 %v1359_v42, %v1357_v41  ;;  %v1084_v45 = vld [vmem:[#allocation5 + $0x70] sm:$0xff]  ;;  %v1365_v48 = vld [vmem:[#allocation2 + $0x60] sm:$0xff]  ;;  %v1367_v49 = vld [vmem:[#allocation2 + $0x68] sm:$0xff] }
  0x1c   :  { %229 = vmatpush.bf16.msra.mxu0 %v1074_v3  ;;  %1089 = vmatpush.bf16.msra.mxu2 %v1074_v3  ;;  %v1369_v50 = vld [vmem:[#allocation2 + $0x160] sm:$0xff]  ;;  %v107_v51 = vld [vmem:[#allocation2 + $0x168] sm:$0xff]  ;;  %v1081_v52 = vld [vmem:[#allocation5 + $0x58] sm:$0xff]  ;;  %v132_v53 = vpack.c.bf16 %v1367_v49, %v1365_v48 }
  0x1d   :  { %562 = vmatpush.bf16.msra.mxu1 %v1084_v45  ;;  %1095 = vmatpush.bf16.msra.mxu3 %v1084_v45  ;;  %v148_v54 = vpack.c.bf16 %v107_v51, %v1369_v50  ;;  %v1080_v55 = vld [vmem:[#allocation5 + $0x50] sm:$0xff]  ;;  %v1079_v56 = vld [vmem:[#allocation5 + $0x48] sm:$0xff]  ;;  %v1078_v57 = vld [vmem:[#allocation5 + $0x40] sm:$0xff] }
  0x1e   :  { %v1374_v58 = vld [vmem:[#allocation2 + $0x70] sm:$0xff]  ;;  %v1376_v59 = vld [vmem:[#allocation2 + $0x78] sm:$0xff]  ;;  %v78_v0 = vld [vmem:[#allocation2 + $0x80] sm:$0xff] }
  0x1f   :  { %v108_v60 = vld [vmem:[#allocation2 + $0x170] sm:$0xff]  ;;  %v109_v61 = vld [vmem:[#allocation2 + $0x178] sm:$0xff]  ;;  %v133_v62 = vpack.c.bf16 %v1376_v59, %v1374_v58  ;;  %v79_v1 = vld [vmem:[#allocation2 + $0x88] sm:$0xff] }
  0x20   :  { %230 = vmatpush.bf16.msra.mxu0 %v1073_v4  ;;  %1090 = vmatpush.bf16.msra.mxu2 %v1073_v4  ;;  %v149_v63 = vpack.c.bf16 %v109_v61, %v108_v60  ;;  %v110_v2 = vld [vmem:[#allocation2 + $0x180] sm:$0xff]  ;;  %v111_v3 = vld [vmem:[#allocation2 + $0x188] sm:$0xff]  ;;  %v134_v4 = vpack.c.bf16 %v79_v1, %v78_v0 }
  0x21   :  { %563 = vmatpush.bf16.msra.mxu1 %v1083_v46  ;;  %1096 = vmatpush.bf16.msra.mxu3 %v1083_v46  ;;  %v83_v0 = vld [vmem:[#allocation2 + $0xa8] sm:$0xff]  ;;  %v114_v1 = vld [vmem:[#allocation2 + $0x1a0] sm:$0xff] }
  0x24   :  { %231 = vmatpush.bf16.msra.mxu0 %v1072_v5  ;;  %1091 = vmatpush.bf16.msra.mxu2 %v1072_v5  ;;  %v150_v5 = vpack.c.bf16 %v111_v3, %v110_v2  ;;  %v115_v2 = vld [vmem:[#allocation2 + $0x1a8] sm:$0xff] }
  0x25   :  { %564 = vmatpush.bf16.msra.mxu1 %v1082_v47  ;;  %1097 = vmatpush.bf16.msra.mxu3 %v1082_v47 }
  0x28   :  { %232 = vmatpush.bf16.msra.mxu0 %v1071_v6  ;;  %1092 = vmatpush.bf16.msra.mxu2 %v1071_v6 }
  0x29   :  { %565 = vmatpush.bf16.msra.mxu1 %v1081_v52  ;;  %1098 = vmatpush.bf16.msra.mxu3 %v1081_v52 }
  0x2c   :  { %233 = vmatpush.bf16.msra.mxu0 %v1070_v7  ;;  %1093 = vmatpush.bf16.msra.mxu2 %v1070_v7  ;;  %v1380_v7 = vld [vmem:[#allocation7] ss:$0 sm:$0xff] }
  0x2d   :  { %566 = vmatpush.bf16.msra.mxu1 %v1080_v55  ;;  %1099 = vmatpush.bf16.msra.mxu3 %v1080_v55 }
  0x2f   :  { %234 = vmatmul.bf16.vlgmr.msra.gmra.mxu0 %v126_v12  ;;  %314 = vmatmul.bf16.vlgmr.msra.gmra.mxu2 %v142_v13 }
  0x31   :  { %567 = vmatpush.bf16.msra.mxu1 %v1079_v56  ;;  %1100 = vmatpush.bf16.msra.mxu3 %v1079_v56 }
  0x35   :  { %568 = vmatpush.bf16.msra.mxu1 %v1078_v57  ;;  %1101 = vmatpush.bf16.msra.mxu3 %v1078_v57 }
  0x3f   :  { %239 = vmatmul.bf16.gmra.mxu0 %v127_v18  ;;  %319 = vmatmul.bf16.gmra.mxu2 %v143_v19 }
  0x4f   :  { %244 = vmatmul.bf16.gmra.mxu0 %v128_v24  ;;  %324 = vmatmul.bf16.gmra.mxu2 %v144_v25 }
  0x5f   :  { %249 = vmatmul.bf16.gmra.mxu0 %v129_v30  ;;  %329 = vmatmul.bf16.gmra.mxu2 %v145_v31  ;;  %v80_v30 = vld [vmem:[#allocation2 + $0x90] sm:$0xff]  ;;  %v81_v31 = vld [vmem:[#allocation2 + $0x98] sm:$0xff] }
  0x60   :  { %v135_v46 = vpack.c.bf16 %v81_v31, %v80_v30 }
  0x6f   :  { %254 = vmatmul.bf16.gmra.mxu0 %v130_v36  ;;  %334 = vmatmul.bf16.gmra.mxu2 %v146_v37  ;;  %v112_v36 = vld [vmem:[#allocation2 + $0x190] sm:$0xff]  ;;  %v113_v37 = vld [vmem:[#allocation2 + $0x198] sm:$0xff] }
  0x70   :  { %v151_v47 = vpack.c.bf16 %v113_v37, %v112_v36 }
  0x7f   :  { %259 = vmatmul.bf16.gmra.mxu0 %v131_v43  ;;  %339 = vmatmul.bf16.gmra.mxu2 %v147_v44 }
  0x8f   :  { %264 = vmatmul.bf16.gmra.mxu0 %v132_v53  ;;  %344 = vmatmul.bf16.gmra.mxu2 %v148_v54 }
  0x9f   :  { %269 = vmatmul.bf16.gmra.mxu0 %v133_v62  ;;  %349 = vmatmul.bf16.gmra.mxu2 %v149_v63  ;;  %v82_v63 = vld [vmem:[#allocation2 + $0xa0] sm:$0xff] }
  0xac   :  { %v235_v6 = vpop.f32.mrf.mxu0 }
  0xad   :  { %v236_v12 = vadd.f32 %v1380_v7, %v235_v6 }
  0xaf   :  { %274 = vmatmul.bf16.gmra.mxu0 %v134_v4  ;;  %354 = vmatmul.bf16.gmra.mxu2 %v150_v5  ;;  %v395_v19 = vmax.f32 %v236_v12, 0.0  ;;  %v136_v12 = vpack.c.bf16 %v83_v0, %v82_v63 }
  0xb2   :  { %v315_v13 = vpop.f32.mrf.mxu2 }
  0xb3   :  { %v316_v38 = vadd.f32 %v1380_v7, %v315_v13  ;;  %v152_v13 = vpack.c.bf16 %v115_v2, %v114_v1 }
  0xb4   :  { %v237_v18 = vpop.f32.mrf.mxu0 }
  0xb5   :  { %v238_v24 = vadd.f32 %v1380_v7, %v237_v18  ;;  %v427_v52 = vmax.f32 %v316_v38, 0.0 }
  0xb7   :  { %v396_v25 = vmax.f32 %v238_v24, 0.0 }
  0xb9   :  { %v459_v43 = vpack.c.bf16 %v396_v25, %v395_v19 }
  0xba   :  { %v317_v44 = vpop.f32.mrf.mxu2 }
  0xbb   :  { %v318_v45 = vadd.f32 %v1380_v7, %v317_v44  ;;  %569 = vmatmul.bf16.vlgmr.msra.gmra.mxu1 %v459_v43  ;;  %v84_v44 = vld [vmem:[#allocation2 + $0xb0] sm:$0xff] }
  0xbc   :  { %v240_v51 = vpop.f32.mrf.mxu0 }
  0xbd   :  { %v428_v53 = vmax.f32 %v318_v45, 0.0  ;;  %v241_v55 = vadd.f32 %v1380_v7, %v240_v51  ;;  %v85_v45 = vld [vmem:[#allocation2 + $0xb8] sm:$0xff] }
  0xbf   :  { %279 = vmatmul.bf16.gmra.mxu0 %v135_v46  ;;  %359 = vmatmul.bf16.gmra.mxu2 %v151_v47  ;;  %v475_v54 = vpack.c.bf16 %v428_v53, %v427_v52  ;;  %v397_v60 = vmax.f32 %v241_v55, 0.0  ;;  %v116_v46 = vld [vmem:[#allocation2 + $0x1b0] sm:$0xff]  ;;  %v117_v47 = vld [vmem:[#allocation2 + $0x1b8] sm:$0xff]  ;;  %v137_v55 = vpack.c.bf16 %v85_v45, %v84_v44 }
  0xc1   :  { %649 = vmatmul.bf16.vlgmr.msra.gmra.mxu3 %v475_v54 }
  0xc2   :  { %v320_v56 = vpop.f32.mrf.mxu2 }
  0xc3   :  { %v321_v3 = vadd.f32 %v1380_v7, %v320_v56  ;;  %v153_v56 = vpack.c.bf16 %v117_v47, %v116_v46 }
  0xc4   :  { %v242_v57 = vpop.f32.mrf.mxu0 }
  0xc5   :  { %v243_v61 = vadd.f32 %v1380_v7, %v242_v57  ;;  %v429_v19 = vmax.f32 %v321_v3, 0.0 }
  0xc7   :  { %v398_v62 = vmax.f32 %v243_v61, 0.0 }
  0xc9   :  { %v460_v4 = vpack.c.bf16 %v398_v62, %v397_v60 }
  0xca   :  { %v322_v5 = vpop.f32.mrf.mxu2 }
  0xcb   :  { %v323_v6 = vadd.f32 %v1380_v7, %v322_v5  ;;  %574 = vmatmul.bf16.gmra.mxu1 %v460_v4  ;;  %v86_v5 = vld [vmem:[#allocation2 + $0xc0] sm:$0xff] }
  0xcc   :  { %v245_v18 = vpop.f32.mrf.mxu0 }
  0xcd   :  { %v430_v24 = vmax.f32 %v323_v6, 0.0  ;;  %v246_v30 = vadd.f32 %v1380_v7, %v245_v18  ;;  %v87_v6 = vld [vmem:[#allocation2 + $0xc8] sm:$0xff] }
  0xcf   :  { %284 = vmatmul.bf16.gmra.mxu0 %v136_v12  ;;  %364 = vmatmul.bf16.gmra.mxu2 %v152_v13  ;;  %v476_v25 = vpack.c.bf16 %v430_v24, %v429_v19  ;;  %v399_v37 = vmax.f32 %v246_v30, 0.0  ;;  %v118_v12 = vld [vmem:[#allocation2 + $0x1c0] sm:$0xff]  ;;  %v119_v13 = vld [vmem:[#allocation2 + $0x1c8] sm:$0xff]  ;;  %v138_v30 = vpack.c.bf16 %v87_v6, %v86_v5 }
  0xd1   :  { %654 = vmatmul.bf16.gmra.mxu3 %v476_v25 }
  0xd2   :  { %v325_v31 = vpop.f32.mrf.mxu2 }
  0xd3   :  { %v326_v51 = vadd.f32 %v1380_v7, %v325_v31  ;;  %v154_v31 = vpack.c.bf16 %v119_v13, %v118_v12 }
  0xd4   :  { %v247_v36 = vpop.f32.mrf.mxu0 }
  0xd5   :  { %v248_v38 = vadd.f32 %v1380_v7, %v247_v36  ;;  %v431_v60 = vmax.f32 %v326_v51, 0.0 }
  0xd7   :  { %v400_v43 = vmax.f32 %v248_v38, 0.0 }
  0xd9   :  { %v461_v52 = vpack.c.bf16 %v400_v43, %v399_v37 }
  0xda   :  { %v327_v53 = vpop.f32.mrf.mxu2 }
  0xdb   :  { %v328_v54 = vadd.f32 %v1380_v7, %v327_v53  ;;  %579 = vmatmul.bf16.gmra.mxu1 %v461_v52  ;;  %v88_v53 = vld [vmem:[#allocation2 + $0xd0] sm:$0xff] }
  0xdc   :  { %v250_v57 = vpop.f32.mrf.mxu0 }
  0xdd   :  { %v432_v61 = vmax.f32 %v328_v54, 0.0  ;;  %v251_v63 = vadd.f32 %v1380_v7, %v250_v57  ;;  %v89_v54 = vld [vmem:[#allocation2 + $0xd8] sm:$0xff] }
  0xdf   :  { %289 = vmatmul.bf16.gmra.mxu0 %v137_v55  ;;  %369 = vmatmul.bf16.gmra.mxu2 %v153_v56  ;;  %v477_v62 = vpack.c.bf16 %v432_v61, %v431_v60  ;;  %v401_v2 = vmax.f32 %v251_v63, 0.0  ;;  %v120_v55 = vld [vmem:[#allocation2 + $0x1d0] sm:$0xff]  ;;  %v121_v56 = vld [vmem:[#allocation2 + $0x1d8] sm:$0xff]  ;;  %v139_v63 = vpack.c.bf16 %v89_v54, %v88_v53 }
  0xe1   :  { %659 = vmatmul.bf16.gmra.mxu3 %v477_v62 }
  0xe2   :  { %v330_v0 = vpop.f32.mrf.mxu2 }
  0xe3   :  { %v331_v18 = vadd.f32 %v1380_v7, %v330_v0  ;;  %v155_v0 = vpack.c.bf16 %v121_v56, %v120_v55 }
  0xe4   :  { %v252_v1 = vpop.f32.mrf.mxu0 }
  0xe5   :  { %v253_v3 = vadd.f32 %v1380_v7, %v252_v1  ;;  %v433_v37 = vmax.f32 %v331_v18, 0.0 }
  0xe7   :  { %v402_v4 = vmax.f32 %v253_v3, 0.0 }
  0xe9   :  { %v462_v19 = vpack.c.bf16 %v402_v4, %v401_v2 }
  0xea   :  { %v332_v24 = vpop.f32.mrf.mxu2 }
  0xeb   :  { %v333_v25 = vadd.f32 %v1380_v7, %v332_v24  ;;  %584 = vmatmul.bf16.gmra.mxu1 %v462_v19  ;;  %v90_v24 = vld [vmem:[#allocation2 + $0xe0] sm:$0xff] }
  0xec   :  { %v255_v36 = vpop.f32.mrf.mxu0 }
  0xed   :  { %v434_v38 = vmax.f32 %v333_v25, 0.0  ;;  %v256_v44 = vadd.f32 %v1380_v7, %v255_v36  ;;  %v91_v25 = vld [vmem:[#allocation2 + $0xe8] sm:$0xff] }
  0xef   :  { %294 = vmatmul.bf16.gmra.mxu0 %v138_v30  ;;  %374 = vmatmul.bf16.gmra.mxu2 %v154_v31  ;;  %v478_v43 = vpack.c.bf16 %v434_v38, %v433_v37  ;;  %v403_v47 = vmax.f32 %v256_v44, 0.0  ;;  %v122_v30 = vld [vmem:[#allocation2 + $0x1e0] sm:$0xff]  ;;  %v123_v31 = vld [vmem:[#allocation2 + $0x1e8] sm:$0xff]  ;;  %v140_v44 = vpack.c.bf16 %v91_v25, %v90_v24 }
  0xf1   :  { %664 = vmatmul.bf16.gmra.mxu3 %v478_v43 }
  0xf2   :  { %v335_v45 = vpop.f32.mrf.mxu2 }
  0xf3   :  { %v336_v57 = vadd.f32 %v1380_v7, %v335_v45  ;;  %v156_v45 = vpack.c.bf16 %v123_v31, %v122_v30 }
  0xf4   :  { %v257_v46 = vpop.f32.mrf.mxu0 }
  0xf5   :  { %v258_v51 = vadd.f32 %v1380_v7, %v257_v46  ;;  %v435_v2 = vmax.f32 %v336_v57, 0.0 }
  0xf7   :  { %v404_v52 = vmax.f32 %v258_v51, 0.0 }
  0xf9   :  { %v463_v60 = vpack.c.bf16 %v404_v52, %v403_v47 }
  0xfa   :  { %v337_v61 = vpop.f32.mrf.mxu2 }
  0xfb   :  { %v338_v62 = vadd.f32 %v1380_v7, %v337_v61  ;;  %589 = vmatmul.bf16.gmra.mxu1 %v463_v60  ;;  %v92_v61 = vld [vmem:[#allocation2 + $0xf0] sm:$0xff] }
  0xfc   :  { %v260_v1 = vpop.f32.mrf.mxu0 }
  0xfd   :  { %v436_v3 = vmax.f32 %v338_v62, 0.0  ;;  %v261_v5 = vadd.f32 %v1380_v7, %v260_v1  ;;  %v93_v62 = vld [vmem:[#allocation2 + $0xf8] sm:$0xff] }
  0xff   :  { %299 = vmatmul.bf16.gmra.mxu0 %v139_v63  ;;  %379 = vmatmul.bf16.gmra.mxu2 %v155_v0  ;;  %v479_v4 = vpack.c.bf16 %v436_v3, %v435_v2  ;;  %v405_v13 = vmax.f32 %v261_v5, 0.0  ;;  %v124_v63 = vld [vmem:[#allocation2 + $0x1f0] sm:$0xff]  ;;  %v125_v0 = vld [vmem:[#allocation2 + $0x1f8] sm:$0xff]  ;;  %v141_v5 = vpack.c.bf16 %v93_v62, %v92_v61 }
 0x101   :  { %669 = vmatmul.bf16.gmra.mxu3 %v479_v4 }
 0x102   :  { %v340_v6 = vpop.f32.mrf.mxu2 }
 0x103   :  { %v341_v36 = vadd.f32 %v1380_v7, %v340_v6  ;;  %v157_v6 = vpack.c.bf16 %v125_v0, %v124_v63 }
 0x104   :  { %v262_v12 = vpop.f32.mrf.mxu0 }
 0x105   :  { %v263_v18 = vadd.f32 %v1380_v7, %v262_v12  ;;  %v437_v47 = vmax.f32 %v341_v36, 0.0 }
 0x107   :  { %v406_v19 = vmax.f32 %v263_v18, 0.0 }
 0x109   :  { %v464_v37 = vpack.c.bf16 %v406_v19, %v405_v13 }
 0x10a   :  { %v342_v38 = vpop.f32.mrf.mxu2 }
 0x10b   :  { %v343_v43 = vadd.f32 %v1380_v7, %v342_v38  ;;  %594 = vmatmul.bf16.gmra.mxu1 %v464_v37 }
 0x10c   :  { %v265_v46 = vpop.f32.mrf.mxu0 }
 0x10d   :  { %v438_v51 = vmax.f32 %v343_v43, 0.0  ;;  %v266_v53 = vadd.f32 %v1380_v7, %v265_v46 }
 0x10f   :  { %304 = vmatmul.bf16.gmra.mxu0 %v140_v44  ;;  %384 = vmatmul.bf16.gmra.mxu2 %v156_v45  ;;  %v480_v52 = vpack.c.bf16 %v438_v51, %v437_v47  ;;  %v407_v56 = vmax.f32 %v266_v53, 0.0 }
 0x111   :  { %674 = vmatmul.bf16.gmra.mxu3 %v480_v52 }
 0x112   :  { %v345_v54 = vpop.f32.mrf.mxu2 }
 0x113   :  { %v346_v1 = vadd.f32 %v1380_v7, %v345_v54 }
 0x114   :  { %v267_v55 = vpop.f32.mrf.mxu0 }
 0x115   :  { %v268_v57 = vadd.f32 %v1380_v7, %v267_v55  ;;  %v439_v13 = vmax.f32 %v346_v1, 0.0 }
 0x117   :  { %v408_v60 = vmax.f32 %v268_v57, 0.0 }
 0x119   :  { %v465_v2 = vpack.c.bf16 %v408_v60, %v407_v56  ;;  %v1416_v60 = vld [vmem:[#allocation7 + $0x1] ss:$0 sm:$0xff] }
 0x11a   :  { %v347_v3 = vpop.f32.mrf.mxu2 }
 0x11b   :  { %v348_v4 = vadd.f32 %v1380_v7, %v347_v3  ;;  %599 = vmatmul.bf16.gmra.mxu1 %v465_v2 }
 0x11c   :  { %v270_v12 = vpop.f32.mrf.mxu0 }
 0x11d   :  { %v440_v18 = vmax.f32 %v348_v4, 0.0  ;;  %v271_v24 = vadd.f32 %v1380_v7, %v270_v12 }
 0x11f   :  { %309 = vmatmul.bf16.gmra.mxu0 %v141_v5  ;;  %389 = vmatmul.bf16.gmra.mxu2 %v157_v6  ;;  %v481_v19 = vpack.c.bf16 %v440_v18, %v439_v13  ;;  %v409_v31 = vmax.f32 %v271_v24, 0.0 }
 0x121   :  { %679 = vmatmul.bf16.gmra.mxu3 %v481_v19 }
 0x122   :  { %v350_v25 = vpop.f32.mrf.mxu2 }
 0x123   :  { %v351_v38 = vadd.f32 %v1380_v7, %v350_v25 }
 0x124   :  { %v272_v30 = vpop.f32.mrf.mxu0 }
 0x125   :  { %v273_v36 = vadd.f32 %v1380_v7, %v272_v30  ;;  %v441_v47 = vmax.f32 %v351_v38, 0.0 }
 0x127   :  { %v410_v37 = vmax.f32 %v273_v36, 0.0 }
 0x129   :  { %v466_v43 = vpack.c.bf16 %v410_v37, %v409_v31 }
 0x12a   :  { %v352_v44 = vpop.f32.mrf.mxu2 }
 0x12b   :  { %v353_v45 = vadd.f32 %v1380_v7, %v352_v44  ;;  %604 = vmatmul.bf16.gmra.mxu1 %v466_v43 }
 0x12c   :  { %v275_v46 = vpop.f32.mrf.mxu0 }
 0x12d   :  { %v442_v51 = vmax.f32 %v353_v45, 0.0  ;;  %v276_v53 = vadd.f32 %v1380_v7, %v275_v46 }
 0x12f   :  { %v482_v52 = vpack.c.bf16 %v442_v51, %v441_v47  ;;  %v411_v56 = vmax.f32 %v276_v53, 0.0 }
 0x131   :  { %684 = vmatmul.bf16.gmra.mxu3 %v482_v52 }
 0x132   :  { %v355_v54 = vpop.f32.mrf.mxu2 }
 0x133   :  { %v356_v63 = vadd.f32 %v1380_v7, %v355_v54 }
 0x134   :  { %v277_v55 = vpop.f32.mrf.mxu0 }
 0x135   :  { %v278_v57 = vadd.f32 %v1380_v7, %v277_v55  ;;  %v443_v6 = vmax.f32 %v356_v63, 0.0 }
 0x137   :  { %v412_v61 = vmax.f32 %v278_v57, 0.0 }
 0x138   :  { %v570_v62 = vpop.f32.mrf.mxu1 }
 0x139   :  { %v571_v0 = vadd.f32 %v1416_v60, %v570_v62  ;;  %v467_v1 = vpack.c.bf16 %v412_v61, %v411_v56 }
 0x13a   :  { %v357_v2 = vpop.f32.mrf.mxu2 }
 0x13b   :  { %v730_v3 = vmax.f32 %v571_v0, 0.0  ;;  %v358_v4 = vadd.f32 %v1380_v7, %v357_v2  ;;  %609 = vmatmul.bf16.gmra.mxu1 %v467_v1 }
 0x13c   :  { %v280_v5 = vpop.f32.mrf.mxu0 }
 0x13d   :  { %vm794_vm0 = vcmp.ge.f32.partialorder %v730_v3, 0.0  ;;  %v444_v12 = vmax.f32 %v358_v4, 0.0  ;;  %v281_v24 = vadd.f32 %v1380_v7, %v280_v5 }
 0x13e   :  { %v858_v13 = vsel %vm794_vm0, %v1293_v8, 0.0 }
 0x13f   :  { %922 = vst [vmem:[#allocation8] sm:$0xff] %v858_v13  ;;  %v483_v18 = vpack.c.bf16 %v444_v12, %v443_v6  ;;  %v413_v38 = vmax.f32 %v281_v24, 0.0 }
 0x140   :  { %v572_v19 = vpop.f32.mrf.mxu1 }
 0x141   :  { %v573_v25 = vadd.f32 %v1416_v60, %v572_v19  ;;  %689 = vmatmul.bf16.gmra.mxu3 %v483_v18 }
 0x142   :  { %v360_v30 = vpop.f32.mrf.mxu2 }
 0x143   :  { %v731_v31 = vmax.f32 %v573_v25, 0.0  ;;  %v361_v51 = vadd.f32 %v1380_v7, %v360_v30 }
 0x144   :  { %v282_v36 = vpop.f32.mrf.mxu0  ;;  %v650_v37 = vpop.f32.mrf.mxu3 }
 0x145   :  { %vm795_vm1 = vcmp.ge.f32.partialorder %v731_v31, 0.0  ;;  %v283_v43 = vadd.f32 %v1380_v7, %v282_v36  ;;  %v651_v44 = vadd.f32 %v1416_v60, %v650_v37  ;;  %v445_v62 = vmax.f32 %v361_v51, 0.0 }
 0x146   :  { %v859_v8 = vsel %vm795_vm1, %v1295_v9, 0.0 }
 0x147   :  { %923 = vst [vmem:[#allocation8 + $0x8] sm:$0xff] %v859_v8  ;;  %v414_v45 = vmax.f32 %v283_v43, 0.0  ;;  %v762_v46 = vmax.f32 %v651_v44, 0.0 }
 0x148   :  { %v575_v47 = vpop.f32.mrf.mxu1 }
 0x149   :  { %vm826_vm2 = vcmp.ge.f32.partialorder %v762_v46, 0.0  ;;  %v576_v52 = vadd.f32 %v1416_v60, %v575_v47  ;;  %v468_v53 = vpack.c.bf16 %v414_v45, %v413_v38 }
 0x14a   :  { %v890_v54 = vsel %vm826_vm2, %v1297_v10, 0.0  ;;  %v362_v55 = vpop.f32.mrf.mxu2 }
 0x14b   :  { %954 = vst [vmem:[#allocation8 + $0x100] sm:$0xff] %v890_v54  ;;  %v732_v56 = vmax.f32 %v576_v52, 0.0  ;;  %v363_v57 = vadd.f32 %v1380_v7, %v362_v55  ;;  %614 = vmatmul.bf16.gmra.mxu1 %v468_v53 }
 0x14c   :  { %v285_v61 = vpop.f32.mrf.mxu0  ;;  %v652_v9 = vpop.f32.mrf.mxu3 }
 0x14d   :  { %vm796_vm3 = vcmp.ge.f32.partialorder %v732_v56, 0.0  ;;  %v446_v63 = vmax.f32 %v363_v57, 0.0  ;;  %v653_v0 = vadd.f32 %v1416_v60, %v652_v9  ;;  %v286_v10 = vadd.f32 %v1380_v7, %v285_v61 }
 0x14e   :  { %v860_v1 = vsel %vm796_vm3, %v1305_v14, 0.0 }
 0x14f   :  { %924 = vst [vmem:[#allocation8 + $0x10] sm:$0xff] %v860_v1  ;;  %v763_v2 = vmax.f32 %v653_v0, 0.0  ;;  %v484_v3 = vpack.c.bf16 %v446_v63, %v445_v62  ;;  %v415_v24 = vmax.f32 %v286_v10, 0.0 }
 0x150   :  { %v577_v4 = vpop.f32.mrf.mxu1 }
 0x151   :  { %vm827_vm4 = vcmp.ge.f32.partialorder %v763_v2, 0.0  ;;  %v578_v5 = vadd.f32 %v1416_v60, %v577_v4  ;;  %694 = vmatmul.bf16.gmra.mxu3 %v484_v3 }
 0x152   :  { %v891_v6 = vsel %vm827_vm4, %v1299_v11, 0.0  ;;  %v365_v12 = vpop.f32.mrf.mxu2 }
 0x153   :  { %955 = vst [vmem:[#allocation8 + $0x108] sm:$0xff] %v891_v6  ;;  %v733_v13 = vmax.f32 %v578_v5, 0.0  ;;  %v366_v38 = vadd.f32 %v1380_v7, %v365_v12 }
 0x154   :  { %v287_v18 = vpop.f32.mrf.mxu0  ;;  %v655_v19 = vpop.f32.mrf.mxu3 }
 0x155   :  { %vm797_vm5 = vcmp.ge.f32.partialorder %v733_v13, 0.0  ;;  %v288_v14 = vadd.f32 %v1380_v7, %v287_v18  ;;  %v656_v25 = vadd.f32 %v1416_v60, %v655_v19  ;;  %v447_v51 = vmax.f32 %v366_v38, 0.0 }
 0x156   :  { %v861_v30 = vsel %vm797_vm5, %v1307_v15, 0.0 }
 0x157   :  { %925 = vst [vmem:[#allocation8 + $0x18] sm:$0xff] %v861_v30  ;;  %v416_v31 = vmax.f32 %v288_v14, 0.0  ;;  %v764_v36 = vmax.f32 %v656_v25, 0.0 }
 0x158   :  { %v580_v37 = vpop.f32.mrf.mxu1 }
 0x159   :  { %vm828_vm6 = vcmp.ge.f32.partialorder %v764_v36, 0.0  ;;  %v581_v11 = vadd.f32 %v1416_v60, %v580_v37  ;;  %v469_v43 = vpack.c.bf16 %v416_v31, %v415_v24 }
 0x15a   :  { %v892_v44 = vsel %vm828_vm6, %v1309_v16, 0.0  ;;  %v367_v8 = vpop.f32.mrf.mxu2 }
 0x15b   :  { %956 = vst [vmem:[#allocation8 + $0x110] sm:$0xff] %v892_v44  ;;  %v734_v45 = vmax.f32 %v581_v11, 0.0  ;;  %v368_v46 = vadd.f32 %v1380_v7, %v367_v8  ;;  %619 = vmatmul.bf16.gmra.mxu1 %v469_v43 }
 0x15c   :  { %v290_v47 = vpop.f32.mrf.mxu0  ;;  %v657_v15 = vpop.f32.mrf.mxu3 }
 0x15d   :  { %vm798_vm7 = vcmp.ge.f32.partialorder %v734_v45, 0.0  ;;  %v448_v52 = vmax.f32 %v368_v46, 0.0  ;;  %v658_v53 = vadd.f32 %v1416_v60, %v657_v15  ;;  %v291_v16 = vadd.f32 %v1380_v7, %v290_v47 }
 0x15e   :  { %v862_v54 = vsel %vm798_vm7, %v1317_v20, 0.0 }
 0x15f   :  { %926 = vst [vmem:[#allocation8 + $0x20] sm:$0xff] %v862_v54  ;;  %v765_v55 = vmax.f32 %v658_v53, 0.0  ;;  %v485_v56 = vpack.c.bf16 %v448_v52, %v447_v51  ;;  %v417_v2 = vmax.f32 %v291_v16, 0.0 }
 0x160   :  { %v582_v57 = vpop.f32.mrf.mxu1 }
 0x161   :  { %vm829_vm8 = vcmp.ge.f32.partialorder %v765_v55, 0.0  ;;  %v583_v61 = vadd.f32 %v1416_v60, %v582_v57  ;;  %699 = vmatmul.bf16.gmra.mxu3 %v485_v56 }
 0x162   :  { %v893_v9 = vsel %vm829_vm8, %v1311_v17, 0.0  ;;  %v370_v62 = vpop.f32.mrf.mxu2 }
 0x163   :  { %957 = vst [vmem:[#allocation8 + $0x118] sm:$0xff] %v893_v9  ;;  %v735_v63 = vmax.f32 %v583_v61, 0.0  ;;  %v371_v12 = vadd.f32 %v1380_v7, %v370_v62 }
 0x164   :  { %v292_v0 = vpop.f32.mrf.mxu0  ;;  %v660_v1 = vpop.f32.mrf.mxu3 }
 0x165   :  { %vm799_vm9 = vcmp.ge.f32.partialorder %v735_v63, 0.0  ;;  %v293_v20 = vadd.f32 %v1380_v7, %v292_v0  ;;  %v661_v3 = vadd.f32 %v1416_v60, %v660_v1  ;;  %v449_v30 = vmax.f32 %v371_v12, 0.0 }
 0x166   :  { %v863_v4 = vsel %vm799_vm9, %v1319_v21, 0.0 }
 0x167   :  { %927 = vst [vmem:[#allocation8 + $0x28] sm:$0xff] %v863_v4  ;;  %v418_v10 = vmax.f32 %v293_v20, 0.0  ;;  %v766_v5 = vmax.f32 %v661_v3, 0.0 }
 0x168   :  { %v585_v6 = vpop.f32.mrf.mxu1 }
 0x169   :  { %vm830_vm10 = vcmp.ge.f32.partialorder %v766_v5, 0.0  ;;  %v586_v17 = vadd.f32 %v1416_v60, %v585_v6  ;;  %v470_v13 = vpack.c.bf16 %v418_v10, %v417_v2 }
 0x16a   :  { %v894_v18 = vsel %vm830_vm10, %v1321_v22, 0.0  ;;  %v372_v19 = vpop.f32.mrf.mxu2 }
 0x16b   :  { %958 = vst [vmem:[#allocation8 + $0x120] sm:$0xff] %v894_v18  ;;  %v736_v24 = vmax.f32 %v586_v17, 0.0  ;;  %v373_v14 = vadd.f32 %v1380_v7, %v372_v19  ;;  %624 = vmatmul.bf16.gmra.mxu1 %v470_v13 }
 0x16c   :  { %v295_v25 = vpop.f32.mrf.mxu0  ;;  %v662_v21 = vpop.f32.mrf.mxu3 }
 0x16d   :  { %vm800_vm11 = vcmp.ge.f32.partialorder %v736_v24, 0.0  ;;  %v450_v31 = vmax.f32 %v373_v14, 0.0  ;;  %v663_v36 = vadd.f32 %v1416_v60, %v662_v21  ;;  %v296_v22 = vadd.f32 %v1380_v7, %v295_v25 }
 0x16e   :  { %v864_v37 = vsel %vm800_vm11, %v1329_v26, 0.0 }
 0x16f   :  { %928 = vst [vmem:[#allocation8 + $0x30] sm:$0xff] %v864_v37  ;;  %v767_v38 = vmax.f32 %v663_v36, 0.0  ;;  %v486_v11 = vpack.c.bf16 %v450_v31, %v449_v30  ;;  %v419_v51 = vmax.f32 %v296_v22, 0.0 }
 0x170   :  { %v587_v43 = vpop.f32.mrf.mxu1 }
 0x171   :  { %vm831_vm12 = vcmp.ge.f32.partialorder %v767_v38, 0.0  ;;  %v588_v44 = vadd.f32 %v1416_v60, %v587_v43  ;;  %704 = vmatmul.bf16.gmra.mxu3 %v486_v11 }
 0x172   :  { %v895_v8 = vsel %vm831_vm12, %v1323_v23, 0.0  ;;  %v375_v45 = vpop.f32.mrf.mxu2 }
 0x173   :  { %959 = vst [vmem:[#allocation8 + $0x128] sm:$0xff] %v895_v8  ;;  %v737_v46 = vmax.f32 %v588_v44, 0.0  ;;  %v376_v57 = vadd.f32 %v1380_v7, %v375_v45 }
 0x174   :  { %v297_v47 = vpop.f32.mrf.mxu0  ;;  %v665_v15 = vpop.f32.mrf.mxu3 }
 0x175   :  { %vm801_vm13 = vcmp.ge.f32.partialorder %v737_v46, 0.0  ;;  %v298_v26 = vadd.f32 %v1380_v7, %v297_v47  ;;  %v666_v52 = vadd.f32 %v1416_v60, %v665_v15  ;;  %v451_v1 = vmax.f32 %v376_v57, 0.0 }
 0x176   :  { %v865_v53 = vsel %vm801_vm13, %v1331_v27, 0.0 }
 0x177   :  { %929 = vst [vmem:[#allocation8 + $0x38] sm:$0xff] %v865_v53  ;;  %v420_v54 = vmax.f32 %v298_v26, 0.0  ;;  %v768_v55 = vmax.f32 %v666_v52, 0.0 }
 0x178   :  { %v590_v56 = vpop.f32.mrf.mxu1 }
 0x179   :  { %v471_v23 = vpack.c.bf16 %v420_v54, %v419_v51  ;;  %vm832_vm14 = vcmp.ge.f32.partialorder %v768_v55, 0.0  ;;  %v591_v16 = vadd.f32 %v1416_v60, %v590_v56 }
 0x17a   :  { %v896_v61 = vsel %vm832_vm14, %v1333_v28, 0.0  ;;  %v377_v9 = vpop.f32.mrf.mxu2 }
 0x17b   :  { %960 = vst [vmem:[#allocation8 + $0x130] sm:$0xff] %v896_v61  ;;  %v738_v62 = vmax.f32 %v591_v16, 0.0  ;;  %v378_v63 = vadd.f32 %v1380_v7, %v377_v9  ;;  %629 = vmatmul.bf16.gmra.mxu1 %v471_v23 }
 0x17c   :  { %v300_v0 = vpop.f32.mrf.mxu0  ;;  %v667_v27 = vpop.f32.mrf.mxu3 }
 0x17d   :  { %vm802_vm15 = vcmp.ge.f32.partialorder %v738_v62, 0.0  ;;  %v452_v2 = vmax.f32 %v378_v63, 0.0  ;;  %v668_v20 = vadd.f32 %v1416_v60, %v667_v27  ;;  %v301_v28 = vadd.f32 %v1380_v7, %v300_v0 }
 0x17e   :  { %v866_v3 = vsel %vm802_vm15, %v1341_v32, 0.0 }
 0x17f   :  { %930 = vst [vmem:[#allocation8 + $0x40] sm:$0xff] %v866_v3  ;;  %v487_v4 = vpack.c.bf16 %v452_v2, %v451_v1  ;;  %v769_v10 = vmax.f32 %v668_v20, 0.0  ;;  %v421_v24 = vmax.f32 %v301_v28, 0.0 }
 0x180   :  { %v592_v5 = vpop.f32.mrf.mxu1 }
 0x181   :  { %vm833_vm0 = vcmp.ge.f32.partialorder %v769_v10, 0.0  ;;  %v593_v6 = vadd.f32 %v1416_v60, %v592_v5  ;;  %709 = vmatmul.bf16.gmra.mxu3 %v487_v4 }
 0x182   :  { %v897_v12 = vsel %vm833_vm0, %v1335_v29, 0.0  ;;  %v380_v17 = vpop.f32.mrf.mxu2 }
 0x183   :  { %961 = vst [vmem:[#allocation8 + $0x138] sm:$0xff] %v897_v12  ;;  %v739_v13 = vmax.f32 %v593_v6, 0.0  ;;  %v381_v36 = vadd.f32 %v1380_v7, %v380_v17 }
 0x184   :  { %v302_v18 = vpop.f32.mrf.mxu0  ;;  %v670_v19 = vpop.f32.mrf.mxu3 }
 0x185   :  { %vm803_vm1 = vcmp.ge.f32.partialorder %v739_v13, 0.0  ;;  %v303_v32 = vadd.f32 %v1380_v7, %v302_v18  ;;  %v671_v14 = vadd.f32 %v1416_v60, %v670_v19  ;;  %v453_v8 = vmax.f32 %v381_v36, 0.0 }
 0x186   :  { %v867_v25 = vsel %vm803_vm1, %v1343_v33, 0.0 }
 0x187   :  { %931 = vst [vmem:[#allocation8 + $0x48] sm:$0xff] %v867_v25  ;;  %v422_v21 = vmax.f32 %v303_v32, 0.0  ;;  %v770_v30 = vmax.f32 %v671_v14, 0.0 }
 0x188   :  { %v595_v31 = vpop.f32.mrf.mxu1 }
 0x189   :  { %v472_v29 = vpack.c.bf16 %v422_v21, %v421_v24  ;;  %vm834_vm2 = vcmp.ge.f32.partialorder %v770_v30, 0.0  ;;  %v596_v37 = vadd.f32 %v1416_v60, %v595_v31 }
 0x18a   :  { %v898_v38 = vsel %vm834_vm2, %v1345_v34, 0.0  ;;  %v382_v11 = vpop.f32.mrf.mxu2 }
 0x18b   :  { %962 = vst [vmem:[#allocation8 + $0x140] sm:$0xff] %v898_v38  ;;  %v740_v43 = vmax.f32 %v596_v37, 0.0  ;;  %v383_v22 = vadd.f32 %v1380_v7, %v382_v11  ;;  %634 = vmatmul.bf16.gmra.mxu1 %v472_v29 }
 0x18c   :  { %v305_v44 = vpop.f32.mrf.mxu0  ;;  %v672_v33 = vpop.f32.mrf.mxu3 }
 0x18d   :  { %vm804_vm3 = vcmp.ge.f32.partialorder %v740_v43, 0.0  ;;  %v454_v45 = vmax.f32 %v383_v22, 0.0  ;;  %v673_v46 = vadd.f32 %v1416_v60, %v672_v33  ;;  %v306_v34 = vadd.f32 %v1380_v7, %v305_v44 }
 0x18e   :  { %v868_v47 = vsel %vm804_vm3, %v1353_v39, 0.0 }
 0x18f   :  { %932 = vst [vmem:[#allocation8 + $0x50] sm:$0xff] %v868_v47  ;;  %v488_v15 = vpack.c.bf16 %v454_v45, %v453_v8  ;;  %v771_v51 = vmax.f32 %v673_v46, 0.0  ;;  %v423_v23 = vmax.f32 %v306_v34, 0.0  ;;  %v1114_v34 = vld [vmem:[#allocation2 + $0x168] sm:$0xff] }
 0x190   :  { %v597_v26 = vpop.f32.mrf.mxu1 }
 0x191   :  { %vm835_vm4 = vcmp.ge.f32.partialorder %v771_v51, 0.0  ;;  %v598_v52 = vadd.f32 %v1416_v60, %v597_v26  ;;  %714 = vmatmul.bf16.gmra.mxu3 %v488_v15 }
 0x192   :  { %v899_v53 = vsel %vm835_vm4, %v1347_v35, 0.0  ;;  %v385_v54 = vpop.f32.mrf.mxu2 }
 0x193   :  { %963 = vst [vmem:[#allocation8 + $0x148] sm:$0xff] %v899_v53  ;;  %v741_v55 = vmax.f32 %v598_v52, 0.0  ;;  %v386_v0 = vadd.f32 %v1380_v7, %v385_v54 }
 0x194   :  { %v307_v56 = vpop.f32.mrf.mxu0  ;;  %v675_v57 = vpop.f32.mrf.mxu3 }
 0x195   :  { %vm805_vm5 = vcmp.ge.f32.partialorder %v741_v55, 0.0  ;;  %v308_v39 = vadd.f32 %v1380_v7, %v307_v56  ;;  %v676_v16 = vadd.f32 %v1416_v60, %v675_v57  ;;  %v455_v10 = vmax.f32 %v386_v0, 0.0 }
 0x196   :  { %v869_v61 = vsel %vm805_vm5, %v1355_v40, 0.0 }
 0x197   :  { %933 = vst [vmem:[#allocation8 + $0x58] sm:$0xff] %v869_v61  ;;  %v424_v9 = vmax.f32 %v308_v39, 0.0  ;;  %v772_v62 = vmax.f32 %v676_v16, 0.0 }
 0x198   :  { %v600_v63 = vpop.f32.mrf.mxu1 }
 0x199   :  { %v473_v35 = vpack.c.bf16 %v424_v9, %v423_v23  ;;  %vm836_vm6 = vcmp.ge.f32.partialorder %v772_v62, 0.0  ;;  %v601_v27 = vadd.f32 %v1416_v60, %v600_v63  ;;  %v1115_v23 = vld [vmem:[#allocation2 + $0x170] sm:$0xff]  ;;  %v1116_v62 = vld [vmem:[#allocation2 + $0x80] sm:$0xff] }
 0x19a   :  { %v900_v1 = vsel %vm836_vm6, %v1357_v41, 0.0  ;;  %v387_v2 = vpop.f32.mrf.mxu2 }
 0x19b   :  { %964 = vst [vmem:[#allocation8 + $0x150] sm:$0xff] %v900_v1  ;;  %v742_v20 = vmax.f32 %v601_v27, 0.0  ;;  %v388_v3 = vadd.f32 %v1380_v7, %v387_v2  ;;  %639 = vmatmul.bf16.gmra.mxu1 %v473_v35  ;;  %v1117_v27 = vld [vmem:[#allocation2 + $0x178] sm:$0xff] }
 0x19c   :  { %v310_v4 = vpop.f32.mrf.mxu0  ;;  %v677_v40 = vpop.f32.mrf.mxu3 }
 0x19d   :  { %vm806_vm7 = vcmp.ge.f32.partialorder %v742_v20, 0.0  ;;  %v456_v5 = vmax.f32 %v388_v3, 0.0  ;;  %v678_v28 = vadd.f32 %v1416_v60, %v677_v40  ;;  %v311_v41 = vadd.f32 %v1380_v7, %v310_v4  ;;  %v1118_v4 = vld [vmem:[#allocation2 + $0x88] sm:$0xff] }
 0x19e   :  { %v870_v6 = vsel %vm806_vm7, %v1365_v48, 0.0 }
 0x19f   :  { %934 = vst [vmem:[#allocation8 + $0x60] sm:$0xff] %v870_v6  ;;  %v489_v12 = vpack.c.bf16 %v456_v5, %v455_v10  ;;  %v773_v17 = vmax.f32 %v678_v28, 0.0  ;;  %v425_v21 = vmax.f32 %v311_v41, 0.0  ;;  %v1119_v6 = vld [vmem:[#allocation2 + $0x180] sm:$0xff] }
 0x1a0   :  { %v602_v13 = vpop.f32.mrf.mxu1 }
 0x1a1   :  { %vm837_vm8 = vcmp.ge.f32.partialorder %v773_v17, 0.0  ;;  %v603_v18 = vadd.f32 %v1416_v60, %v602_v13  ;;  %719 = vmatmul.bf16.gmra.mxu3 %v489_v12 }
 0x1a2   :  { %v901_v19 = vsel %vm837_vm8, %v1359_v42, 0.0  ;;  %v390_v24 = vpop.f32.mrf.mxu2 }
 0x1a3   :  { %965 = vst [vmem:[#allocation8 + $0x158] sm:$0xff] %v901_v19  ;;  %v743_v32 = vmax.f32 %v603_v18, 0.0  ;;  %v391_v38 = vadd.f32 %v1380_v7, %v390_v24  ;;  %v1120_v18 = vld [vmem:[#allocation2 + $0x90] sm:$0xff] }
 0x1a4   :  { %v312_v14 = vpop.f32.mrf.mxu0  ;;  %v680_v25 = vpop.f32.mrf.mxu3 }
 0x1a5   :  { %vm807_vm9 = vcmp.ge.f32.partialorder %v743_v32, 0.0  ;;  %v313_v48 = vadd.f32 %v1380_v7, %v312_v14  ;;  %v681_v30 = vadd.f32 %v1416_v60, %v680_v25  ;;  %v1121_v25 = vld [vmem:[#allocation2 + $0x188] sm:$0xff] }
 0x1a6   :  { %v871_v31 = vsel %vm807_vm9, %v1367_v49, 0.0  ;;  %v457_v49 = vmax.f32 %v391_v38, 0.0 }
 0x1a7   :  { %935 = vst [vmem:[#allocation8 + $0x68] sm:$0xff] %v871_v31  ;;  %v426_v36 = vmax.f32 %v313_v48, 0.0  ;;  %v774_v29 = vmax.f32 %v681_v30, 0.0 }
 0x1a8   :  { %v605_v37 = vpop.f32.mrf.mxu1 }
 0x1a9   :  { %v474_v42 = vpack.c.bf16 %v426_v36, %v425_v21  ;;  %vm838_vm10 = vcmp.ge.f32.partialorder %v774_v29, 0.0  ;;  %v606_v11 = vadd.f32 %v1416_v60, %v605_v37  ;;  %v1122_v36 = vld [vmem:[#allocation2 + $0x98] sm:$0xff] }
 0x1aa   :  { %v902_v43 = vsel %vm838_vm10, %v1369_v50, 0.0  ;;  %v392_v22 = vpop.f32.mrf.mxu2 }
 0x1ab   :  { %966 = vst [vmem:[#allocation8 + $0x160] sm:$0xff] %v902_v43  ;;  %v744_v44 = vmax.f32 %v606_v11, 0.0  ;;  %v393_v33 = vadd.f32 %v1380_v7, %v392_v22  ;;  %644 = vmatmul.bf16.gmra.mxu1 %v474_v42  ;;  %v1123_v11 = vld [vmem:[#allocation2 + $0x190] sm:$0xff] }
 0x1ac   :  { %v682_v8 = vpop.f32.mrf.mxu3 }
 0x1ad   :  { %vm808_vm11 = vcmp.ge.f32.partialorder %v744_v44, 0.0  ;;  %v458_v45 = vmax.f32 %v393_v33, 0.0  ;;  %v683_v46 = vadd.f32 %v1416_v60, %v682_v8  ;;  %v1124_v8 = vld [vmem:[#allocation2 + $0xa0] sm:$0xff] }
 0x1ae   :  { %v872_v47 = vsel %vm808_vm11, %v1374_v58, 0.0 }
 0x1af   :  { %936 = vst [vmem:[#allocation8 + $0x70] sm:$0xff] %v872_v47  ;;  %v490_v15 = vpack.c.bf16 %v458_v45, %v457_v49  ;;  %v775_v51 = vmax.f32 %v683_v46, 0.0 }
 0x1b0   :  { %v607_v26 = vpop.f32.mrf.mxu1 }
 0x1b1   :  { %vm839_vm12 = vcmp.ge.f32.partialorder %v775_v51, 0.0  ;;  %v608_v50 = vadd.f32 %v1416_v60, %v607_v26  ;;  %724 = vmatmul.bf16.gmra.mxu3 %v490_v15  ;;  %v1125_v15 = vld [vmem:[#allocation2 + $0x198] sm:$0xff] }
 0x1b2   :  { %v903_v52 = vsel %vm839_vm12, %v1114_v34, 0.0 }
 0x1b3   :  { %967 = vst [vmem:[#allocation8 + $0x168] sm:$0xff] %v903_v52  ;;  %v745_v7 = vmax.f32 %v608_v50, 0.0  ;;  %v1126_v52 = vld [vmem:[#allocation2 + $0xa8] sm:$0xff] }
 0x1b4   :  { %v685_v53 = vpop.f32.mrf.mxu3 }
 0x1b5   :  { %vm809_vm13 = vcmp.ge.f32.partialorder %v745_v7, 0.0  ;;  %v686_v54 = vadd.f32 %v1416_v60, %v685_v53 }
 0x1b6   :  { %v873_v55 = vsel %vm809_vm13, %v1376_v59, 0.0 }
 0x1b7   :  { %937 = vst [vmem:[#allocation8 + $0x78] sm:$0xff] %v873_v55  ;;  %v776_v58 = vmax.f32 %v686_v54, 0.0 }
 0x1b8   :  { %v610_v56 = vpop.f32.mrf.mxu1 }
 0x1b9   :  { %vm840_vm14 = vcmp.ge.f32.partialorder %v776_v58, 0.0  ;;  %v611_v57 = vadd.f32 %v1416_v60, %v610_v56  ;;  %v1127_v58 = vld [vmem:[#allocation2 + $0x1a0] sm:$0xff] }
 0x1ba   :  { %v904_v39 = vsel %vm840_vm14, %v1115_v23, 0.0 }
 0x1bb   :  { %968 = vst [vmem:[#allocation8 + $0x170] sm:$0xff] %v904_v39  ;;  %v746_v16 = vmax.f32 %v611_v57, 0.0 }
 0x1bc   :  { %v687_v61 = vpop.f32.mrf.mxu3 }
 0x1bd   :  { %vm810_vm15 = vcmp.ge.f32.partialorder %v746_v16, 0.0  ;;  %v688_v9 = vadd.f32 %v1416_v60, %v687_v61  ;;  %v1128_v16 = vld [vmem:[#allocation2 + $0xb0] sm:$0xff] }
 0x1be   :  { %v874_v63 = vsel %vm810_vm15, %v1116_v62, 0.0 }
 0x1bf   :  { %938 = vst [vmem:[#allocation8 + $0x80] sm:$0xff] %v874_v63  ;;  %v777_v0 = vmax.f32 %v688_v9, 0.0 }
 0x1c0   :  { %v612_v35 = vpop.f32.mrf.mxu1 }
 0x1c1   :  { %vm841_vm0 = vcmp.ge.f32.partialorder %v777_v0, 0.0  ;;  %v613_v59 = vadd.f32 %v1416_v60, %v612_v35  ;;  %v1129_v0 = vld [vmem:[#allocation2 + $0x1a8] sm:$0xff] }
 0x1c2   :  { %v905_v1 = vsel %vm841_vm0, %v1117_v27, 0.0 }
 0x1c3   :  { %969 = vst [vmem:[#allocation8 + $0x178] sm:$0xff] %v905_v1  ;;  %v747_v2 = vmax.f32 %v613_v59, 0.0 }
 0x1c4   :  { %v690_v20 = vpop.f32.mrf.mxu3 }
 0x1c5   :  { %vm811_vm1 = vcmp.ge.f32.partialorder %v747_v2, 0.0  ;;  %v691_v3 = vadd.f32 %v1416_v60, %v690_v20  ;;  %v1130_v2 = vld [vmem:[#allocation2 + $0xb8] sm:$0xff] }
 0x1c6   :  { %v875_v40 = vsel %vm811_vm1, %v1118_v4, 0.0 }
 0x1c7   :  { %939 = vst [vmem:[#allocation8 + $0x88] sm:$0xff] %v875_v40  ;;  %v778_v10 = vmax.f32 %v691_v3, 0.0 }
 0x1c8   :  { %v615_v5 = vpop.f32.mrf.mxu1 }
 0x1c9   :  { %vm842_vm2 = vcmp.ge.f32.partialorder %v778_v10, 0.0  ;;  %v616_v28 = vadd.f32 %v1416_v60, %v615_v5  ;;  %v1131_v10 = vld [vmem:[#allocation2 + $0x1b0] sm:$0xff] }
 0x1ca   :  { %v906_v12 = vsel %vm842_vm2, %v1119_v6, 0.0 }
 0x1cb   :  { %970 = vst [vmem:[#allocation8 + $0x180] sm:$0xff] %v906_v12  ;;  %v748_v17 = vmax.f32 %v616_v28, 0.0 }
 0x1cc   :  { %v692_v13 = vpop.f32.mrf.mxu3 }
 0x1cd   :  { %vm812_vm3 = vcmp.ge.f32.partialorder %v748_v17, 0.0  ;;  %v693_v41 = vadd.f32 %v1416_v60, %v692_v13  ;;  %v1132_v17 = vld [vmem:[#allocation2 + $0xc0] sm:$0xff] }
 0x1ce   :  { %v876_v19 = vsel %vm812_vm3, %v1120_v18, 0.0 }
 0x1cf   :  { %940 = vst [vmem:[#allocation8 + $0x90] sm:$0xff] %v876_v19  ;;  %v779_v24 = vmax.f32 %v693_v41, 0.0 }
 0x1d0   :  { %v617_v32 = vpop.f32.mrf.mxu1 }
 0x1d1   :  { %vm843_vm4 = vcmp.ge.f32.partialorder %v779_v24, 0.0  ;;  %v618_v14 = vadd.f32 %v1416_v60, %v617_v32  ;;  %v1133_v24 = vld [vmem:[#allocation2 + $0x1b8] sm:$0xff] }
 0x1d2   :  { %v907_v21 = vsel %vm843_vm4, %v1121_v25, 0.0 }
 0x1d3   :  { %971 = vst [vmem:[#allocation8 + $0x188] sm:$0xff] %v907_v21  ;;  %v749_v48 = vmax.f32 %v618_v14, 0.0 }
 0x1d4   :  { %v695_v30 = vpop.f32.mrf.mxu3 }
 0x1d5   :  { %vm813_vm5 = vcmp.ge.f32.partialorder %v749_v48, 0.0  ;;  %v696_v31 = vadd.f32 %v1416_v60, %v695_v30  ;;  %v1134_v48 = vld [vmem:[#allocation2 + $0xc8] sm:$0xff] }
 0x1d6   :  { %v877_v29 = vsel %vm813_vm5, %v1122_v36, 0.0 }
 0x1d7   :  { %941 = vst [vmem:[#allocation8 + $0x98] sm:$0xff] %v877_v29  ;;  %v780_v37 = vmax.f32 %v696_v31, 0.0 }
 0x1d8   :  { %v620_v38 = vpop.f32.mrf.mxu1 }
 0x1d9   :  { %vm844_vm6 = vcmp.ge.f32.partialorder %v780_v37, 0.0  ;;  %v621_v42 = vadd.f32 %v1416_v60, %v620_v38  ;;  %v1135_v37 = vld [vmem:[#allocation2 + $0x1c0] sm:$0xff] }
 0x1da   :  { %v908_v43 = vsel %vm844_vm6, %v1123_v11, 0.0 }
 0x1db   :  { %972 = vst [vmem:[#allocation8 + $0x190] sm:$0xff] %v908_v43  ;;  %v750_v22 = vmax.f32 %v621_v42, 0.0 }
 0x1dc   :  { %v697_v44 = vpop.f32.mrf.mxu3 }
 0x1dd   :  { %vm814_vm7 = vcmp.ge.f32.partialorder %v750_v22, 0.0  ;;  %v698_v33 = vadd.f32 %v1416_v60, %v697_v44  ;;  %v1136_v22 = vld [vmem:[#allocation2 + $0xd0] sm:$0xff] }
 0x1de   :  { %v878_v49 = vsel %vm814_vm7, %v1124_v8, 0.0 }
 0x1df   :  { %942 = vst [vmem:[#allocation8 + $0xa0] sm:$0xff] %v878_v49  ;;  %v781_v45 = vmax.f32 %v698_v33, 0.0 }
 0x1e0   :  { %v622_v46 = vpop.f32.mrf.mxu1 }
 0x1e1   :  { %vm845_vm8 = vcmp.ge.f32.partialorder %v781_v45, 0.0  ;;  %v623_v47 = vadd.f32 %v1416_v60, %v622_v46  ;;  %v1137_v45 = vld [vmem:[#allocation2 + $0x1c8] sm:$0xff] }
 0x1e2   :  { %v909_v51 = vsel %vm845_vm8, %v1125_v15, 0.0 }
 0x1e3   :  { %973 = vst [vmem:[#allocation8 + $0x198] sm:$0xff] %v909_v51  ;;  %v751_v26 = vmax.f32 %v623_v47, 0.0 }
 0x1e4   :  { %v700_v50 = vpop.f32.mrf.mxu3 }
 0x1e5   :  { %vm815_vm9 = vcmp.ge.f32.partialorder %v751_v26, 0.0  ;;  %v701_v34 = vadd.f32 %v1416_v60, %v700_v50  ;;  %v1138_v26 = vld [vmem:[#allocation2 + $0xd8] sm:$0xff] }
 0x1e6   :  { %v879_v7 = vsel %vm815_vm9, %v1126_v52, 0.0 }
 0x1e7   :  { %943 = vst [vmem:[#allocation8 + $0xa8] sm:$0xff] %v879_v7  ;;  %v782_v53 = vmax.f32 %v701_v34, 0.0 }
 0x1e8   :  { %v625_v54 = vpop.f32.mrf.mxu1 }
 0x1e9   :  { %vm846_vm10 = vcmp.ge.f32.partialorder %v782_v53, 0.0  ;;  %v626_v55 = vadd.f32 %v1416_v60, %v625_v54  ;;  %v1139_v53 = vld [vmem:[#allocation2 + $0x1d0] sm:$0xff] }
 0x1ea   :  { %v910_v56 = vsel %vm846_vm10, %v1127_v58, 0.0 }
 0x1eb   :  { %974 = vst [vmem:[#allocation8 + $0x1a0] sm:$0xff] %v910_v56  ;;  %v752_v57 = vmax.f32 %v626_v55, 0.0 }
 0x1ec   :  { %v702_v23 = vpop.f32.mrf.mxu3 }
 0x1ed   :  { %vm816_vm11 = vcmp.ge.f32.partialorder %v752_v57, 0.0  ;;  %v703_v39 = vadd.f32 %v1416_v60, %v702_v23  ;;  %v1140_v57 = vld [vmem:[#allocation2 + $0xe0] sm:$0xff] }
 0x1ee   :  { %v880_v61 = vsel %vm816_vm11, %v1128_v16, 0.0 }
 0x1ef   :  { %944 = vst [vmem:[#allocation8 + $0xb0] sm:$0xff] %v880_v61  ;;  %v783_v9 = vmax.f32 %v703_v39, 0.0 }
 0x1f0   :  { %v627_v62 = vpop.f32.mrf.mxu1 }
 0x1f1   :  { %vm847_vm12 = vcmp.ge.f32.partialorder %v783_v9, 0.0  ;;  %v628_v63 = vadd.f32 %v1416_v60, %v627_v62  ;;  %v1141_v9 = vld [vmem:[#allocation2 + $0x1d8] sm:$0xff] }
 0x1f2   :  { %v911_v35 = vsel %vm847_vm12, %v1129_v0, 0.0 }
 0x1f3   :  { %975 = vst [vmem:[#allocation8 + $0x1a8] sm:$0xff] %v911_v35  ;;  %v753_v59 = vmax.f32 %v628_v63, 0.0 }
 0x1f4   :  { %v705_v27 = vpop.f32.mrf.mxu3 }
 0x1f5   :  { %vm817_vm13 = vcmp.ge.f32.partialorder %v753_v59, 0.0  ;;  %v706_v1 = vadd.f32 %v1416_v60, %v705_v27  ;;  %v1142_v59 = vld [vmem:[#allocation2 + $0xe8] sm:$0xff] }
 0x1f6   :  { %v881_v20 = vsel %vm817_vm13, %v1130_v2, 0.0 }
 0x1f7   :  { %945 = vst [vmem:[#allocation8 + $0xb8] sm:$0xff] %v881_v20  ;;  %v784_v3 = vmax.f32 %v706_v1, 0.0 }
 0x1f8   :  { %v630_v4 = vpop.f32.mrf.mxu1 }
 0x1f9   :  { %vm848_vm14 = vcmp.ge.f32.partialorder %v784_v3, 0.0  ;;  %v631_v40 = vadd.f32 %v1416_v60, %v630_v4  ;;  %v1143_v3 = vld [vmem:[#allocation2 + $0x1e0] sm:$0xff] }
 0x1fa   :  { %v912_v5 = vsel %vm848_vm14, %v1131_v10, 0.0 }
 0x1fb   :  { %976 = vst [vmem:[#allocation8 + $0x1b0] sm:$0xff] %v912_v5  ;;  %v754_v28 = vmax.f32 %v631_v40, 0.0 }
 0x1fc   :  { %v707_v6 = vpop.f32.mrf.mxu3 }
 0x1fd   :  { %vm818_vm15 = vcmp.ge.f32.partialorder %v754_v28, 0.0  ;;  %v708_v12 = vadd.f32 %v1416_v60, %v707_v6  ;;  %v1144_v28 = vld [vmem:[#allocation2 + $0xf0] sm:$0xff] }
 0x1fe   :  { %v882_v13 = vsel %vm818_vm15, %v1132_v17, 0.0 }
 0x1ff   :  { %946 = vst [vmem:[#allocation8 + $0xc0] sm:$0xff] %v882_v13  ;;  %v785_v41 = vmax.f32 %v708_v12, 0.0 }
 0x200   :  { %v632_v18 = vpop.f32.mrf.mxu1 }
 0x201   :  { %vm849_vm0 = vcmp.ge.f32.partialorder %v785_v41, 0.0  ;;  %v633_v19 = vadd.f32 %v1416_v60, %v632_v18  ;;  %v1145_v41 = vld [vmem:[#allocation2 + $0x1e8] sm:$0xff] }
 0x202   :  { %v913_v32 = vsel %vm849_vm0, %v1133_v24, 0.0 }
 0x203   :  { %977 = vst [vmem:[#allocation8 + $0x1b8] sm:$0xff] %v913_v32  ;;  %v755_v14 = vmax.f32 %v633_v19, 0.0 }
 0x204   :  { %v710_v25 = vpop.f32.mrf.mxu3 }
 0x205   :  { %vm819_vm1 = vcmp.ge.f32.partialorder %v755_v14, 0.0  ;;  %v711_v21 = vadd.f32 %v1416_v60, %v710_v25  ;;  %v1146_v14 = vld [vmem:[#allocation2 + $0xf8] sm:$0xff] }
 0x206   :  { %v883_v30 = vsel %vm819_vm1, %v1134_v48, 0.0  ;;  %v1147_v48 = vld [vmem:[#allocation2 + $0x1f0] sm:$0xff] }
 0x207   :  { %947 = vst [vmem:[#allocation8 + $0xc8] sm:$0xff] %v883_v30  ;;  %v786_v31 = vmax.f32 %v711_v21, 0.0 }
 0x208   :  { %v635_v36 = vpop.f32.mrf.mxu1 }
 0x209   :  { %vm850_vm2 = vcmp.ge.f32.partialorder %v786_v31, 0.0  ;;  %v636_v29 = vadd.f32 %v1416_v60, %v635_v36 }
 0x20a   :  { %v914_v38 = vsel %vm850_vm2, %v1135_v37, 0.0  ;;  %v1148_v37 = vld [vmem:[#allocation2 + $0x1f8] sm:$0xff] }
 0x20b   :  { %978 = vst [vmem:[#allocation8 + $0x1c0] sm:$0xff] %v914_v38  ;;  %v756_v42 = vmax.f32 %v636_v29, 0.0 }
 0x20c   :  { %v712_v11 = vpop.f32.mrf.mxu3 }
 0x20d   :  { %vm820_vm3 = vcmp.ge.f32.partialorder %v756_v42, 0.0  ;;  %v713_v43 = vadd.f32 %v1416_v60, %v712_v11 }
 0x20e   :  { %v884_v44 = vsel %vm820_vm3, %v1136_v22, 0.0 }
 0x20f   :  { %948 = vst [vmem:[#allocation8 + $0xd0] sm:$0xff] %v884_v44  ;;  %v787_v33 = vmax.f32 %v713_v43, 0.0 }
 0x210   :  { %v637_v8 = vpop.f32.mrf.mxu1 }
 0x211   :  { %vm851_vm4 = vcmp.ge.f32.partialorder %v787_v33, 0.0  ;;  %v638_v49 = vadd.f32 %v1416_v60, %v637_v8 }
 0x212   :  { %v915_v46 = vsel %vm851_vm4, %v1137_v45, 0.0 }
 0x213   :  { %979 = vst [vmem:[#allocation8 + $0x1c8] sm:$0xff] %v915_v46  ;;  %v757_v47 = vmax.f32 %v638_v49, 0.0 }
 0x214   :  { %v715_v15 = vpop.f32.mrf.mxu3 }
 0x215   :  { %vm821_vm5 = vcmp.ge.f32.partialorder %v757_v47, 0.0  ;;  %v716_v51 = vadd.f32 %v1416_v60, %v715_v15 }
 0x216   :  { %v885_v50 = vsel %vm821_vm5, %v1138_v26, 0.0 }
 0x217   :  { %949 = vst [vmem:[#allocation8 + $0xd8] sm:$0xff] %v885_v50  ;;  %v788_v34 = vmax.f32 %v716_v51, 0.0 }
 0x218   :  { %v640_v52 = vpop.f32.mrf.mxu1 }
 0x219   :  { %vm852_vm6 = vcmp.ge.f32.partialorder %v788_v34, 0.0  ;;  %v641_v7 = vadd.f32 %v1416_v60, %v640_v52 }
 0x21a   :  { %v916_v54 = vsel %vm852_vm6, %v1139_v53, 0.0 }
 0x21b   :  { %980 = vst [vmem:[#allocation8 + $0x1d0] sm:$0xff] %v916_v54  ;;  %v758_v55 = vmax.f32 %v641_v7, 0.0 }
 0x21c   :  { %v717_v58 = vpop.f32.mrf.mxu3 }
 0x21d   :  { %vm822_vm7 = vcmp.ge.f32.partialorder %v758_v55, 0.0  ;;  %v718_v56 = vadd.f32 %v1416_v60, %v717_v58 }
 0x21e   :  { %v886_v23 = vsel %vm822_vm7, %v1140_v57, 0.0 }
 0x21f   :  { %950 = vst [vmem:[#allocation8 + $0xe0] sm:$0xff] %v886_v23  ;;  %v789_v39 = vmax.f32 %v718_v56, 0.0 }
 0x220   :  { %v642_v16 = vpop.f32.mrf.mxu1 }
 0x221   :  { %vm853_vm8 = vcmp.ge.f32.partialorder %v789_v39, 0.0  ;;  %v643_v61 = vadd.f32 %v1416_v60, %v642_v16 }
 0x222   :  { %v917_v62 = vsel %vm853_vm8, %v1141_v9, 0.0 }
 0x223   :  { %981 = vst [vmem:[#allocation8 + $0x1d8] sm:$0xff] %v917_v62  ;;  %v759_v63 = vmax.f32 %v643_v61, 0.0 }
 0x224   :  { %v720_v0 = vpop.f32.mrf.mxu3 }
 0x225   :  { %vm823_vm9 = vcmp.ge.f32.partialorder %v759_v63, 0.0  ;;  %v721_v35 = vadd.f32 %v1416_v60, %v720_v0 }
 0x226   :  { %v887_v27 = vsel %vm823_vm9, %v1142_v59, 0.0 }
 0x227   :  { %951 = vst [vmem:[#allocation8 + $0xe8] sm:$0xff] %v887_v27  ;;  %v790_v1 = vmax.f32 %v721_v35, 0.0 }
 0x228   :  { %v645_v2 = vpop.f32.mrf.mxu1 }
 0x229   :  { %vm854_vm10 = vcmp.ge.f32.partialorder %v790_v1, 0.0  ;;  %v646_v20 = vadd.f32 %v1416_v60, %v645_v2 }
 0x22a   :  { %v918_v4 = vsel %vm854_vm10, %v1143_v3, 0.0 }
 0x22b   :  { %982 = vst [vmem:[#allocation8 + $0x1e0] sm:$0xff] %v918_v4  ;;  %v760_v40 = vmax.f32 %v646_v20, 0.0 }
 0x22c   :  { %v722_v10 = vpop.f32.mrf.mxu3 }
 0x22d   :  { %vm824_vm11 = vcmp.ge.f32.partialorder %v760_v40, 0.0  ;;  %v723_v5 = vadd.f32 %v1416_v60, %v722_v10 }
 0x22e   :  { %v888_v6 = vsel %vm824_vm11, %v1144_v28, 0.0 }
 0x22f   :  { %952 = vst [vmem:[#allocation8 + $0xf0] sm:$0xff] %v888_v6  ;;  %v791_v12 = vmax.f32 %v723_v5, 0.0 }
 0x230   :  { %v647_v17 = vpop.f32.mrf.mxu1 }
 0x231   :  { %vm855_vm12 = vcmp.ge.f32.partialorder %v791_v12, 0.0  ;;  %v648_v13 = vadd.f32 %v1416_v60, %v647_v17 }
 0x232   :  { %v919_v18 = vsel %vm855_vm12, %v1145_v41, 0.0 }
 0x233   :  { %983 = vst [vmem:[#allocation8 + $0x1e8] sm:$0xff] %v919_v18  ;;  %v761_v19 = vmax.f32 %v648_v13, 0.0 }
 0x234   :  { %v725_v24 = vpop.f32.mrf.mxu3 }
 0x235   :  { %vm825_vm13 = vcmp.ge.f32.partialorder %v761_v19, 0.0  ;;  %v726_v32 = vadd.f32 %v1416_v60, %v725_v24 }
 0x236   :  { %v889_v25 = vsel %vm825_vm13, %v1146_v14, 0.0 }
 0x237   :  { %953 = vst [vmem:[#allocation8 + $0xf8] sm:$0xff] %v889_v25  ;;  %v792_v21 = vmax.f32 %v726_v32, 0.0 }
 0x239   :  { %vm856_vm14 = vcmp.ge.f32.partialorder %v792_v21, 0.0 }
 0x23a   :  { %v920_v30 = vsel %vm856_vm14, %v1147_v48, 0.0 }
 0x23b   :  { %984 = vst [vmem:[#allocation8 + $0x1f0] sm:$0xff] %v920_v30 }
 0x23c   :  { %v727_v31 = vpop.f32.mrf.mxu3 }
 0x23d   :  { %v728_v36 = vadd.f32 %v1416_v60, %v727_v31 }
 0x23f   :  { %v793_v29 = vmax.f32 %v728_v36, 0.0 }
 0x241   :  { %vm857_vm15 = vcmp.ge.f32.partialorder %v793_v29, 0.0 }
 0x242   :  { %v921_v38 = vsel %vm857_vm15, %v1148_v37, 0.0 }
 0x243   :  { %985 = vst [vmem:[#allocation8 + $0x1f8] sm:$0xff] %v921_v38 }
 0x244   :  { %998 = dma.vmem_to_hbm [thread:$0]  %s991_s4, 8192, %s993_s7, [#allocation4], %s1255_s24, %s1255_s24, %s1256_s25  }
 0x245   :  { %1249 = dma.done.wait [#allocation4], 8192  }
 0x246   :  { %1250 = vsyncadd [#allocation4], 4294959104 }
 0x247   :  { %1003 = vsyncpa [#allocation3], 1 }
 0x248   :  { %1004 = vsyncpa [#allocation6], 1 }
 0x249   :  { %1005 = vsyncpa [#allocation4], 1 }

</bundles_post_ra>
